<compile_context>
chip_gen: v7x
topology: tpu7x:2x2x1
jax: 0.10.0
libtpu: 0.0.40
codegen_flags: <defaults>
</compile_context>

<pallas_src>
import math

import jax
import jax.numpy as jnp
from jax import lax
from jax.experimental import pallas as pl
from jax.experimental.pallas import tpu as pltpu

# ----------------------------- config ---------------------------------------
B = 2            # batch
S = 8            # sequence length
H = 64           # hidden size
NH = 4           # attention heads
DH = H // NH     # head dim
I = 128          # FFN intermediate size
L = 2            # encoder layers
VOCAB = 100
VOCAB_PAD = 104  # vocab rows padded to a sublane-tile multiple
NUM_CLASSES = 4
CLS_PAD = 128    # lane-dense padded classifier width
LN_EPS = 1e-12

# embedding slab row layout: [word table | pos+type | emb LN gamma | emb LN beta]
EMB_POS_OFF = VOCAB_PAD                 # 104
EMB_LNG_ROW = VOCAB_PAD + B * S         # 120
EMB_LNB_ROW = EMB_LNG_ROW + 1           # 121
EMB_ROWS = EMB_LNB_ROW + 1              # 122

# per-layer main weight slab (lane-concat, 128-lane-aligned starts): wqkv|wo|wi
W_QKV_OFF, W_O_OFF, W_I_OFF = 0, 256, 384
W_MAIN_COLS = 512

# per-layer packed bias / LayerNorm vector slab (128-lane-aligned starts)
V_BQKV, V_BO, V_LN1G, V_LN1B, V_BI, V_BF, V_LN2G, V_LN2B = (
    0, 256, 384, 512, 640, 768, 896, 1024)
VEC_COLS = 1152


# ----------------------------- in-kernel helpers -----------------------------
def _layernorm(y, g, b):
    # mean and mean-of-squares are independent lane reductions (co-issue on XLU)
    mu = jnp.mean(y, axis=-1, keepdims=True)
    ms = jnp.mean(y * y, axis=-1, keepdims=True)
    var = ms - mu * mu
    return (y - mu) * lax.rsqrt(var + LN_EPS) * g + b


def _gelu(y):
    # TODO(synk): BERT reference uses exact erf-GELU; tanh approximation used here.
    c = math.sqrt(2.0 / math.pi)
    return 0.5 * y * (1.0 + jnp.tanh(c * (y + 0.044715 * y * y * y)))


def _attention(qkv, wo, bias_slab):
    # qkv: (B*S, 3H); the 1/sqrt(DH) scale is already folded into the Q columns.
    # 1) all (batch, head) score tiles, stacked along sublanes
    scores = []
    for b in range(B):
        r0 = b * S
        for h in range(NH):
            c0 = h * DH
            qh = qkv[r0:r0 + S, c0:c0 + DH]                       # (S, DH)
            kh = qkv[r0:r0 + S, H + c0:H + c0 + DH]               # (S, DH)
            scores.append(lax.dot_general(                        # q @ k^T (NT)
                qh, kh, (((1,), (1,)), ((), ())),
                preferred_element_type=jnp.float32))              # (S, S)
    s = jnp.concatenate(scores, axis=0) + bias_slab               # (B*NH*S, S)

    # 2) ONE batched softmax over all head/batch tiles
    #    (max-subtraction kept: protects the -1e9-masked rows with approx recip)
    s = s - jnp.max(s, axis=-1, keepdims=True)
    p = jnp.exp(s)
    p = p * pl.reciprocal(jnp.sum(p, axis=-1, keepdims=True), approx=True)

    # 3) per-(b,h) context, lane-concatenated so ONE (B*S,H)@(H,H) out-proj suffices
    ctx_rows = []
    for b in range(B):
        r0 = b * S
        ctx_h = []
        for h in range(NH):
            ph = p[(b * NH + h) * S:(b * NH + h + 1) * S, :]      # (S, S)
            vh = qkv[r0:r0 + S, 2 * H + h * DH:2 * H + (h + 1) * DH]
            ctx_h.append(jnp.dot(ph, vh,
                                 preferred_element_type=jnp.float32))  # (S, DH)
        ctx_rows.append(jnp.concatenate(ctx_h, axis=1))           # (S, H)
    ctx = jnp.concatenate(ctx_rows, axis=0)                       # (B*S, H)
    return jnp.dot(ctx, wo, preferred_element_type=jnp.float32)   # bias added by caller


# ----------------------------- fused kernel ----------------------------------
def _news_classifier_kernel(ids_ref, mask_ref, emb_ref, wmain_ref, wf_ref,
                            vec_ref, cls_ref, logits_ref):
    f32 = jnp.float32

    # ---- in-kernel token embedding lookup: one-hot @ table on the MXU --------
    ids = ids_ref[...]                                            # (B*S, 1) int32
    onehot = (lax.broadcasted_iota(jnp.int32, (B * S, VOCAB_PAD), 1)
              == ids).astype(f32)                                 # (B*S, VOCAB_PAD)
    emb = jnp.dot(onehot, emb_ref[0:VOCAB_PAD, :],
                  preferred_element_type=f32)                     # (B*S, H)
    emb = emb + emb_ref[EMB_POS_OFF:EMB_POS_OFF + B * S, :]       # + pos + type(0)
    emb_g = emb_ref[EMB_LNG_ROW:EMB_LNG_ROW + 1, :]               # (1, H)
    emb_b = emb_ref[EMB_LNB_ROW:EMB_LNB_ROW + 1, :]               # (1, H)

    # ---- attention-mask bias slab, built ONCE and reused by every layer ------
    mask_bias = (1.0 - mask_ref[...].astype(f32)) * -1e9          # (B, S)
    bias_slab = jnp.concatenate(
        [jnp.broadcast_to(mask_bias[b:b + 1, :], (NH * S, S)) for b in range(B)],
        axis=0)                                                   # (B*NH*S, S)

    # ---- embedding LayerNorm (no residual) ------------------------------------
    x = _layernorm(emb, emb_g, emb_b)                             # (B*S, H)

    # ---- encoder layers (static unroll; all weights resident in VMEM) --------
    for l in range(L):
        qkv = (jnp.dot(x, wmain_ref[l, :, W_QKV_OFF:W_QKV_OFF + 3 * H],
                       preferred_element_type=f32)
               + vec_ref[l, :, V_BQKV:V_BQKV + 3 * H])            # (B*S, 3H)
        attn = (_attention(qkv, wmain_ref[l, :, W_O_OFF:W_O_OFF + H], bias_slab)
                + vec_ref[l, :, V_BO:V_BO + H])
        x = _layernorm(attn + x,
                       vec_ref[l, :, V_LN1G:V_LN1G + H],
                       vec_ref[l, :, V_LN1B:V_LN1B + H])

        inter = _gelu(jnp.dot(x, wmain_ref[l, :, W_I_OFF:W_I_OFF + I],
                              preferred_element_type=f32)
                      + vec_ref[l, :, V_BI:V_BI + I])             # (B*S, I)
        ffn = (jnp.dot(inter, wf_ref[l], preferred_element_type=f32)
               + vec_ref[l, :, V_BF:V_BF + H])
        x = _layernorm(ffn + x,
                       vec_ref[l, :, V_LN2G:V_LN2G + H],
                       vec_ref[l, :, V_LN2B:V_LN2B + H])

    # ---- classifier head over all B*S rows, lane-dense (B*S, 128) store ------
    # pooled_output = outputs[0][:, 0, :]; Dropout(0.3) in eval mode is identity.
    # [CLS] rows (0, S, 2S, ...) and lanes [:NUM_CLASSES] are selected outside.
    logits_ref[...] = (jnp.dot(x, cls_ref[0:H, :], preferred_element_type=f32)
                       + cls_ref[H:H + 1, :])


# ----------------------------- wrapper ---------------------------------------
def _full_spec(arr):
    nd = arr.ndim
    return pl.BlockSpec(arr.shape, lambda i, _nd=nd: (0,) * _nd)


@jax.jit
def news_classifier_forward(params, input_ids, attention_mask):
    ids = input_ids.reshape(B * S, 1).astype(jnp.int32)
    mask = attention_mask.astype(jnp.int32)

    args = (ids, mask, params["emb_slab"], params["w_main"], params["wf"],
            params["vecs"], params["cls_slab"])
    logits_pad = pl.pallas_call(
        _news_classifier_kernel,
        out_shape=jax.ShapeDtypeStruct((B * S, CLS_PAD), jnp.float32),
        grid=(1,),
        in_specs=[_full_spec(a) for a in args],
        out_specs=pl.BlockSpec((B * S, CLS_PAD), lambda i: (0, 0)),
        compiler_params=pltpu.CompilerParams(
            dimension_semantics=("arbitrary",)),
    )(*args)
    # [CLS] token of each batch row, first NUM_CLASSES lanes are the real logits
    return logits_pad[0::S, :NUM_CLASSES]


# ----------------------------- parameter init --------------------------------
def init_params(key):
    def nrm(k, shape, std=0.02):
        return std * jax.random.normal(k, shape, dtype=jnp.float32)

    keys = iter(jax.random.split(key, 32))
    scale = 1.0 / math.sqrt(DH)

    word_emb = nrm(next(keys), (VOCAB, H))
    pos_emb = nrm(next(keys), (S, H))
    type_emb = nrm(next(keys), (2, H))

    # embedding slab: [word table (padded) | pos+type | emb LN gamma | emb LN beta]
    emb_slab = jnp.zeros((EMB_ROWS, H), jnp.float32)
    emb_slab = emb_slab.at[:VOCAB, :].set(word_emb)
    pos_type = jnp.tile(pos_emb + type_emb[0][None, :], (B, 1))     # token_type_ids == 0
    emb_slab = emb_slab.at[EMB_POS_OFF:EMB_POS_OFF + B * S, :].set(pos_type)
    emb_slab = emb_slab.at[EMB_LNG_ROW, :].set(jnp.ones((H,), jnp.float32))
    # emb LN beta row stays zero

    w_main_layers, wf_layers, vec_layers = [], [], []
    for _ in range(L):
        wq = nrm(next(keys), (H, H))
        wk = nrm(next(keys), (H, H))
        wv = nrm(next(keys), (H, H))
        wo = nrm(next(keys), (H, H))
        wi = nrm(next(keys), (H, I))
        wf = nrm(next(keys), (I, H))

        wm = jnp.zeros((H, W_MAIN_COLS), jnp.float32)
        # fold the 1/sqrt(DH) attention scale into the Q projection columns
        wm = wm.at[:, W_QKV_OFF:W_QKV_OFF + 3 * H].set(
            jnp.concatenate([wq * scale, wk, wv], axis=1))
        wm = wm.at[:, W_O_OFF:W_O_OFF + H].set(wo)
        wm = wm.at[:, W_I_OFF:W_I_OFF + I].set(wi)
        w_main_layers.append(wm)
        wf_layers.append(wf)

        vec = jnp.zeros((1, VEC_COLS), jnp.float32)
        # NOTE: biases are zero; with a real checkpoint the Q segment of bqkv
        # (lanes [0:H] at V_BQKV) must also be scaled by 1/sqrt(DH).
        vec = vec.at[0, V_LN1G:V_LN1G + H].set(1.0)
        vec = vec.at[0, V_LN2G:V_LN2G + H].set(1.0)
        vec_layers.append(vec)

    cls_w = nrm(next(keys), (H, NUM_CLASSES))
    # lane-dense padded classifier head: rows [0:H] weight, row H bias
    cls_slab = jnp.zeros((H + 1, CLS_PAD), jnp.float32)
    cls_slab = cls_slab.at[:H, :NUM_CLASSES].set(cls_w)

    return {
        "emb_slab": emb_slab,
        "w_main": jnp.stack(w_main_layers),   # (L, H, 512)
        "wf": jnp.stack(wf_layers),           # (L, I, H)
        "vecs": jnp.stack(vec_layers),        # (L, 1, 1152)
        "cls_slab": cls_slab,                 # (H+1, 128)
    }


# ----------------------------- main -------------------------------------------
if __name__ == "__main__":
    key = jax.random.PRNGKey(0)
    pkey, ikey = jax.random.split(key)
    params = init_params(pkey)

    input_ids = jax.random.randint(ikey, (B, S), 0, VOCAB, dtype=jnp.int32)
    attention_mask = jnp.ones((B, S), dtype=jnp.int32)
    attention_mask = attention_mask.at[1, S - 2:].set(0)   # exercise masking

    logits = news_classifier_forward(params, input_ids, attention_mask)
    logits = jax.block_until_ready(logits)

    assert logits.shape == (B, NUM_CLASSES)
    assert bool(jnp.all(jnp.isfinite(logits)))
    print("KERNEL_OK")
</pallas_src>

<mosaic_0001>
module attributes {stable_mosaic.version = 11 : i64} {
  func.func @_news_classifier_kernel(%arg0: i32, %arg1: memref<16x1xi32, #tpu.memory_space<vmem>>, %arg2: memref<2x8xi32, #tpu.memory_space<vmem>>, %arg3: memref<122x64xf32, #tpu.memory_space<vmem>>, %arg4: memref<2x64x512xf32, #tpu.memory_space<vmem>>, %arg5: memref<2x128x64xf32, #tpu.memory_space<vmem>>, %arg6: memref<2x1x1152xf32, #tpu.memory_space<vmem>>, %arg7: memref<65x128xf32, #tpu.memory_space<vmem>>, %arg8: memref<16x128xf32, #tpu.memory_space<vmem>>) attributes {dimension_semantics = [#tpu.dimension_semantics<arbitrary>], iteration_bounds = array<i64: 1>, scalar_prefetch = 0 : i64, scratch_operands = 0 : i64, tpu.core_type = #tpu.core_type<tc>, window_params = [{pipeline_mode = #tpu.pipeline_mode<synchronous>, transform_indices = @transform_0, window_bounds = array<i64: 16, 1>}, {pipeline_mode = #tpu.pipeline_mode<synchronous>, transform_indices = @transform_1, window_bounds = array<i64: 2, 8>}, {pipeline_mode = #tpu.pipeline_mode<synchronous>, transform_indices = @transform_2, window_bounds = array<i64: 122, 64>}, {pipeline_mode = #tpu.pipeline_mode<synchronous>, transform_indices = @transform_3, window_bounds = array<i64: 2, 64, 512>}, {pipeline_mode = #tpu.pipeline_mode<synchronous>, transform_indices = @transform_4, window_bounds = array<i64: 2, 128, 64>}, {pipeline_mode = #tpu.pipeline_mode<synchronous>, transform_indices = @transform_5, window_bounds = array<i64: 2, 1, 1152>}, {pipeline_mode = #tpu.pipeline_mode<synchronous>, transform_indices = @transform_6, window_bounds = array<i64: 65, 128>}, {pipeline_mode = #tpu.pipeline_mode<synchronous>, transform_indices = @transform_7, window_bounds = array<i64: 16, 128>}]} {
    %c0 = arith.constant 0 : index
    %c0_0 = arith.constant 0 : index
    %0 = vector.load %arg1[%c0, %c0_0] : memref<16x1xi32, #tpu.memory_space<vmem>>, vector<16x1xi32>
    %1 = tpu.iota {dimensions = array<i32: 1>} : vector<16x104xi32>
    %2 = vector.broadcast %0 : vector<16x1xi32> to vector<16x104xi32>
    %3 = arith.cmpi eq, %1, %2 : vector<16x104xi32>
    %4 = arith.extui %3 : vector<16x104xi1> to vector<16x104xi32>
    %5 = arith.sitofp %4 : vector<16x104xi32> to vector<16x104xf32>
    %c0_1 = arith.constant 0 : index
    %c0_2 = arith.constant 0 : index
    %6 = vector.load %arg3[%c0_1, %c0_2] : memref<122x64xf32, #tpu.memory_space<vmem>>, vector<104x64xf32>
    %cst = arith.constant dense<0.000000e+00> : vector<16x64xf32>
    %7 = tpu.matmul %5, %6, %cst {dimension_numbers = #tpu.dot_dimension_numbers<[1], [0], [0], [1], [0, 0, 1, 1], [], []>} : vector<16x104xf32>, vector<104x64xf32>, vector<16x64xf32> -> vector<16x64xf32>
    %c104 = arith.constant 104 : index
    %c0_3 = arith.constant 0 : index
    %8 = vector.load %arg3[%c104, %c0_3] : memref<122x64xf32, #tpu.memory_space<vmem>>, vector<16x64xf32>
    %9 = arith.addf %7, %8 : vector<16x64xf32>
    %c120 = arith.constant 120 : index
    %c0_4 = arith.constant 0 : index
    %10 = vector.load %arg3[%c120, %c0_4] : memref<122x64xf32, #tpu.memory_space<vmem>>, vector<1x64xf32>
    %c121 = arith.constant 121 : index
    %c0_5 = arith.constant 0 : index
    %11 = vector.load %arg3[%c121, %c0_5] : memref<122x64xf32, #tpu.memory_space<vmem>>, vector<1x64xf32>
    %c0_6 = arith.constant 0 : index
    %c0_7 = arith.constant 0 : index
    %12 = vector.load %arg2[%c0_6, %c0_7] : memref<2x8xi32, #tpu.memory_space<vmem>>, vector<2x8xi32>
    %13 = arith.sitofp %12 : vector<2x8xi32> to vector<2x8xf32>
    %cst_8 = arith.constant 1.000000e+00 : f32
    %14 = vector.broadcast %cst_8 : f32 to vector<2x8xf32>
    %15 = arith.subf %14, %13 : vector<2x8xf32>
    %cst_9 = arith.constant -1.000000e+09 : f32
    %16 = vector.broadcast %cst_9 : f32 to vector<2x8xf32>
    %17 = arith.mulf %15, %16 : vector<2x8xf32>
    %18 = vector.extract_strided_slice %17 {offsets = [0, 0], sizes = [1, 8], strides = [1, 1]} : vector<2x8xf32> to vector<1x8xf32>
    %19 = vector.shape_cast %18 : vector<1x8xf32> to vector<1x8xf32>
    %20 = vector.broadcast %19 : vector<1x8xf32> to vector<32x8xf32>
    %21 = vector.extract_strided_slice %17 {offsets = [1, 0], sizes = [1, 8], strides = [1, 1]} : vector<2x8xf32> to vector<1x8xf32>
    %22 = vector.shape_cast %21 : vector<1x8xf32> to vector<1x8xf32>
    %23 = vector.broadcast %22 : vector<1x8xf32> to vector<32x8xf32>
    %24 = tpu.concatenate %20, %23 in 0 : vector<32x8xf32>, vector<32x8xf32> -> vector<64x8xf32>
    %cst_10 = arith.constant dense<0.000000e+00> : vector<16xf32>
    %25 = vector.multi_reduction <add>, %9, %cst_10 [1] : vector<16x64xf32> to vector<16xf32>
    %26 = vector.shape_cast %25 : vector<16xf32> to vector<16x1xf32>
    %cst_11 = arith.constant 6.400000e+01 : f32
    %27 = vector.broadcast %cst_11 : f32 to vector<16x1xf32>
    %28 = arith.divf %26, %27 : vector<16x1xf32>
    %29 = arith.mulf %9, %9 : vector<16x64xf32>
    %cst_12 = arith.constant dense<0.000000e+00> : vector<16xf32>
    %30 = vector.multi_reduction <add>, %29, %cst_12 [1] : vector<16x64xf32> to vector<16xf32>
    %31 = vector.shape_cast %30 : vector<16xf32> to vector<16x1xf32>
    %cst_13 = arith.constant 6.400000e+01 : f32
    %32 = vector.broadcast %cst_13 : f32 to vector<16x1xf32>
    %33 = arith.divf %31, %32 : vector<16x1xf32>
    %34 = arith.mulf %28, %28 : vector<16x1xf32>
    %35 = arith.subf %33, %34 : vector<16x1xf32>
    %36 = vector.broadcast %28 : vector<16x1xf32> to vector<16x64xf32>
    %37 = arith.subf %9, %36 : vector<16x64xf32>
    %cst_14 = arith.constant 9.99999996E-13 : f32
    %38 = vector.broadcast %cst_14 : f32 to vector<16x1xf32>
    %39 = arith.addf %35, %38 : vector<16x1xf32>
    %40 = math.rsqrt %39 : vector<16x1xf32>
    %41 = vector.broadcast %40 : vector<16x1xf32> to vector<16x64xf32>
    %42 = arith.mulf %37, %41 : vector<16x64xf32>
    %43 = vector.broadcast %10 : vector<1x64xf32> to vector<16x64xf32>
    %44 = arith.mulf %42, %43 : vector<16x64xf32>
    %45 = vector.broadcast %11 : vector<1x64xf32> to vector<16x64xf32>
    %46 = arith.addf %44, %45 : vector<16x64xf32>
    %c0_15 = arith.constant 0 : index
    %c0_16 = arith.constant 0 : index
    %c0_17 = arith.constant 0 : index
    %47 = vector.load %arg4[%c0_15, %c0_16, %c0_17] : memref<2x64x512xf32, #tpu.memory_space<vmem>>, vector<1x64x192xf32>
    %48 = vector.shape_cast %47 : vector<1x64x192xf32> to vector<64x192xf32>
    %cst_18 = arith.constant dense<0.000000e+00> : vector<16x192xf32>
    %49 = tpu.matmul %46, %48, %cst_18 {dimension_numbers = #tpu.dot_dimension_numbers<[1], [0], [0], [1], [0, 0, 1, 1], [], []>} : vector<16x64xf32>, vector<64x192xf32>, vector<16x192xf32> -> vector<16x192xf32>
    %c0_19 = arith.constant 0 : index
    %c0_20 = arith.constant 0 : index
    %c0_21 = arith.constant 0 : index
    %50 = vector.load %arg6[%c0_19, %c0_20, %c0_21] : memref<2x1x1152xf32, #tpu.memory_space<vmem>>, vector<1x1x192xf32>
    %51 = vector.shape_cast %50 : vector<1x1x192xf32> to vector<1x192xf32>
    %52 = vector.broadcast %51 : vector<1x192xf32> to vector<16x192xf32>
    %53 = arith.addf %49, %52 : vector<16x192xf32>
    %c0_22 = arith.constant 0 : index
    %c0_23 = arith.constant 0 : index
    %c256 = arith.constant 256 : index
    %54 = vector.load %arg4[%c0_22, %c0_23, %c256] : memref<2x64x512xf32, #tpu.memory_space<vmem>>, vector<1x64x64xf32>
    %55 = vector.shape_cast %54 : vector<1x64x64xf32> to vector<64x64xf32>
    %56 = vector.extract_strided_slice %53 {offsets = [0, 0], sizes = [8, 16], strides = [1, 1]} : vector<16x192xf32> to vector<8x16xf32>
    %57 = vector.extract_strided_slice %53 {offsets = [0, 64], sizes = [8, 16], strides = [1, 1]} : vector<16x192xf32> to vector<8x16xf32>
    %cst_24 = arith.constant dense<0.000000e+00> : vector<8x8xf32>
    %58 = tpu.matmul %56, %57, %cst_24 {dimension_numbers = #tpu.dot_dimension_numbers<[1], [1], [0], [0], [0, 0, 1, 0], [], []>} : vector<8x16xf32>, vector<8x16xf32>, vector<8x8xf32> -> vector<8x8xf32>
    %59 = vector.extract_strided_slice %53 {offsets = [0, 16], sizes = [8, 16], strides = [1, 1]} : vector<16x192xf32> to vector<8x16xf32>
    %60 = vector.extract_strided_slice %53 {offsets = [0, 80], sizes = [8, 16], strides = [1, 1]} : vector<16x192xf32> to vector<8x16xf32>
    %cst_25 = arith.constant dense<0.000000e+00> : vector<8x8xf32>
    %61 = tpu.matmul %59, %60, %cst_25 {dimension_numbers = #tpu.dot_dimension_numbers<[1], [1], [0], [0], [0, 0, 1, 0], [], []>} : vector<8x16xf32>, vector<8x16xf32>, vector<8x8xf32> -> vector<8x8xf32>
    %62 = vector.extract_strided_slice %53 {offsets = [0, 32], sizes = [8, 16], strides = [1, 1]} : vector<16x192xf32> to vector<8x16xf32>
    %63 = vector.extract_strided_slice %53 {offsets = [0, 96], sizes = [8, 16], strides = [1, 1]} : vector<16x192xf32> to vector<8x16xf32>
    %cst_26 = arith.constant dense<0.000000e+00> : vector<8x8xf32>
    %64 = tpu.matmul %62, %63, %cst_26 {dimension_numbers = #tpu.dot_dimension_numbers<[1], [1], [0], [0], [0, 0, 1, 0], [], []>} : vector<8x16xf32>, vector<8x16xf32>, vector<8x8xf32> -> vector<8x8xf32>
    %65 = vector.extract_strided_slice %53 {offsets = [0, 48], sizes = [8, 16], strides = [1, 1]} : vector<16x192xf32> to vector<8x16xf32>
    %66 = vector.extract_strided_slice %53 {offsets = [0, 112], sizes = [8, 16], strides = [1, 1]} : vector<16x192xf32> to vector<8x16xf32>
    %cst_27 = arith.constant dense<0.000000e+00> : vector<8x8xf32>
    %67 = tpu.matmul %65, %66, %cst_27 {dimension_numbers = #tpu.dot_dimension_numbers<[1], [1], [0], [0], [0, 0, 1, 0], [], []>} : vector<8x16xf32>, vector<8x16xf32>, vector<8x8xf32> -> vector<8x8xf32>
    %68 = vector.extract_strided_slice %53 {offsets = [8, 0], sizes = [8, 16], strides = [1, 1]} : vector<16x192xf32> to vector<8x16xf32>
    %69 = vector.extract_strided_slice %53 {offsets = [8, 64], sizes = [8, 16], strides = [1, 1]} : vector<16x192xf32> to vector<8x16xf32>
    %cst_28 = arith.constant dense<0.000000e+00> : vector<8x8xf32>
    %70 = tpu.matmul %68, %69, %cst_28 {dimension_numbers = #tpu.dot_dimension_numbers<[1], [1], [0], [0], [0, 0, 1, 0], [], []>} : vector<8x16xf32>, vector<8x16xf32>, vector<8x8xf32> -> vector<8x8xf32>
    %71 = vector.extract_strided_slice %53 {offsets = [8, 16], sizes = [8, 16], strides = [1, 1]} : vector<16x192xf32> to vector<8x16xf32>
    %72 = vector.extract_strided_slice %53 {offsets = [8, 80], sizes = [8, 16], strides = [1, 1]} : vector<16x192xf32> to vector<8x16xf32>
    %cst_29 = arith.constant dense<0.000000e+00> : vector<8x8xf32>
    %73 = tpu.matmul %71, %72, %cst_29 {dimension_numbers = #tpu.dot_dimension_numbers<[1], [1], [0], [0], [0, 0, 1, 0], [], []>} : vector<8x16xf32>, vector<8x16xf32>, vector<8x8xf32> -> vector<8x8xf32>
    %74 = vector.extract_strided_slice %53 {offsets = [8, 32], sizes = [8, 16], strides = [1, 1]} : vector<16x192xf32> to vector<8x16xf32>
    %75 = vector.extract_strided_slice %53 {offsets = [8, 96], sizes = [8, 16], strides = [1, 1]} : vector<16x192xf32> to vector<8x16xf32>
    %cst_30 = arith.constant dense<0.000000e+00> : vector<8x8xf32>
    %76 = tpu.matmul %74, %75, %cst_30 {dimension_numbers = #tpu.dot_dimension_numbers<[1], [1], [0], [0], [0, 0, 1, 0], [], []>} : vector<8x16xf32>, vector<8x16xf32>, vector<8x8xf32> -> vector<8x8xf32>
    %77 = vector.extract_strided_slice %53 {offsets = [8, 48], sizes = [8, 16], strides = [1, 1]} : vector<16x192xf32> to vector<8x16xf32>
    %78 = vector.extract_strided_slice %53 {offsets = [8, 112], sizes = [8, 16], strides = [1, 1]} : vector<16x192xf32> to vector<8x16xf32>
    %cst_31 = arith.constant dense<0.000000e+00> : vector<8x8xf32>
    %79 = tpu.matmul %77, %78, %cst_31 {dimension_numbers = #tpu.dot_dimension_numbers<[1], [1], [0], [0], [0, 0, 1, 0], [], []>} : vector<8x16xf32>, vector<8x16xf32>, vector<8x8xf32> -> vector<8x8xf32>
    %80 = tpu.concatenate %58, %61, %64, %67, %70, %73, %76, %79 in 0 : vector<8x8xf32>, vector<8x8xf32>, vector<8x8xf32>, vector<8x8xf32>, vector<8x8xf32>, vector<8x8xf32>, vector<8x8xf32>, vector<8x8xf32> -> vector<64x8xf32>
    %81 = arith.addf %80, %24 : vector<64x8xf32>
    %cst_32 = arith.constant dense<0xFF800000> : vector<64xf32>
    %82 = vector.multi_reduction <maximumf>, %81, %cst_32 [1] : vector<64x8xf32> to vector<64xf32>
    %83 = vector.shape_cast %82 : vector<64xf32> to vector<64x1xf32>
    %84 = vector.broadcast %83 : vector<64x1xf32> to vector<64x8xf32>
    %85 = arith.subf %81, %84 : vector<64x8xf32>
    %86 = math.exp %85 : vector<64x8xf32>
    %cst_33 = arith.constant dense<0.000000e+00> : vector<64xf32>
    %87 = vector.multi_reduction <add>, %86, %cst_33 [1] : vector<64x8xf32> to vector<64xf32>
    %88 = vector.shape_cast %87 : vector<64xf32> to vector<64x1xf32>
    %89 = tpu.reciprocal %88 {approx = true} : vector<64x1xf32> -> vector<64x1xf32>
    %90 = vector.broadcast %89 : vector<64x1xf32> to vector<64x8xf32>
    %91 = arith.mulf %86, %90 : vector<64x8xf32>
    %92 = vector.extract_strided_slice %91 {offsets = [0, 0], sizes = [8, 8], strides = [1, 1]} : vector<64x8xf32> to vector<8x8xf32>
    %93 = vector.extract_strided_slice %53 {offsets = [0, 128], sizes = [8, 16], strides = [1, 1]} : vector<16x192xf32> to vector<8x16xf32>
    %cst_34 = arith.constant dense<0.000000e+00> : vector<8x16xf32>
    %94 = tpu.matmul %92, %93, %cst_34 {dimension_numbers = #tpu.dot_dimension_numbers<[1], [0], [0], [1], [0, 0, 1, 1], [], []>} : vector<8x8xf32>, vector<8x16xf32>, vector<8x16xf32> -> vector<8x16xf32>
    %95 = vector.extract_strided_slice %91 {offsets = [8, 0], sizes = [8, 8], strides = [1, 1]} : vector<64x8xf32> to vector<8x8xf32>
    %96 = vector.extract_strided_slice %53 {offsets = [0, 144], sizes = [8, 16], strides = [1, 1]} : vector<16x192xf32> to vector<8x16xf32>
    %cst_35 = arith.constant dense<0.000000e+00> : vector<8x16xf32>
    %97 = tpu.matmul %95, %96, %cst_35 {dimension_numbers = #tpu.dot_dimension_numbers<[1], [0], [0], [1], [0, 0, 1, 1], [], []>} : vector<8x8xf32>, vector<8x16xf32>, vector<8x16xf32> -> vector<8x16xf32>
    %98 = vector.extract_strided_slice %91 {offsets = [16, 0], sizes = [8, 8], strides = [1, 1]} : vector<64x8xf32> to vector<8x8xf32>
    %99 = vector.extract_strided_slice %53 {offsets = [0, 160], sizes = [8, 16], strides = [1, 1]} : vector<16x192xf32> to vector<8x16xf32>
    %cst_36 = arith.constant dense<0.000000e+00> : vector<8x16xf32>
    %100 = tpu.matmul %98, %99, %cst_36 {dimension_numbers = #tpu.dot_dimension_numbers<[1], [0], [0], [1], [0, 0, 1, 1], [], []>} : vector<8x8xf32>, vector<8x16xf32>, vector<8x16xf32> -> vector<8x16xf32>
    %101 = vector.extract_strided_slice %91 {offsets = [24, 0], sizes = [8, 8], strides = [1, 1]} : vector<64x8xf32> to vector<8x8xf32>
    %102 = vector.extract_strided_slice %53 {offsets = [0, 176], sizes = [8, 16], strides = [1, 1]} : vector<16x192xf32> to vector<8x16xf32>
    %cst_37 = arith.constant dense<0.000000e+00> : vector<8x16xf32>
    %103 = tpu.matmul %101, %102, %cst_37 {dimension_numbers = #tpu.dot_dimension_numbers<[1], [0], [0], [1], [0, 0, 1, 1], [], []>} : vector<8x8xf32>, vector<8x16xf32>, vector<8x16xf32> -> vector<8x16xf32>
    %104 = tpu.concatenate %94, %97, %100, %103 in 1 : vector<8x16xf32>, vector<8x16xf32>, vector<8x16xf32>, vector<8x16xf32> -> vector<8x64xf32>
    %105 = vector.extract_strided_slice %91 {offsets = [32, 0], sizes = [8, 8], strides = [1, 1]} : vector<64x8xf32> to vector<8x8xf32>
    %106 = vector.extract_strided_slice %53 {offsets = [8, 128], sizes = [8, 16], strides = [1, 1]} : vector<16x192xf32> to vector<8x16xf32>
    %cst_38 = arith.constant dense<0.000000e+00> : vector<8x16xf32>
    %107 = tpu.matmul %105, %106, %cst_38 {dimension_numbers = #tpu.dot_dimension_numbers<[1], [0], [0], [1], [0, 0, 1, 1], [], []>} : vector<8x8xf32>, vector<8x16xf32>, vector<8x16xf32> -> vector<8x16xf32>
    %108 = vector.extract_strided_slice %91 {offsets = [40, 0], sizes = [8, 8], strides = [1, 1]} : vector<64x8xf32> to vector<8x8xf32>
    %109 = vector.extract_strided_slice %53 {offsets = [8, 144], sizes = [8, 16], strides = [1, 1]} : vector<16x192xf32> to vector<8x16xf32>
    %cst_39 = arith.constant dense<0.000000e+00> : vector<8x16xf32>
    %110 = tpu.matmul %108, %109, %cst_39 {dimension_numbers = #tpu.dot_dimension_numbers<[1], [0], [0], [1], [0, 0, 1, 1], [], []>} : vector<8x8xf32>, vector<8x16xf32>, vector<8x16xf32> -> vector<8x16xf32>
    %111 = vector.extract_strided_slice %91 {offsets = [48, 0], sizes = [8, 8], strides = [1, 1]} : vector<64x8xf32> to vector<8x8xf32>
    %112 = vector.extract_strided_slice %53 {offsets = [8, 160], sizes = [8, 16], strides = [1, 1]} : vector<16x192xf32> to vector<8x16xf32>
    %cst_40 = arith.constant dense<0.000000e+00> : vector<8x16xf32>
    %113 = tpu.matmul %111, %112, %cst_40 {dimension_numbers = #tpu.dot_dimension_numbers<[1], [0], [0], [1], [0, 0, 1, 1], [], []>} : vector<8x8xf32>, vector<8x16xf32>, vector<8x16xf32> -> vector<8x16xf32>
    %114 = vector.extract_strided_slice %91 {offsets = [56, 0], sizes = [8, 8], strides = [1, 1]} : vector<64x8xf32> to vector<8x8xf32>
    %115 = vector.extract_strided_slice %53 {offsets = [8, 176], sizes = [8, 16], strides = [1, 1]} : vector<16x192xf32> to vector<8x16xf32>
    %cst_41 = arith.constant dense<0.000000e+00> : vector<8x16xf32>
    %116 = tpu.matmul %114, %115, %cst_41 {dimension_numbers = #tpu.dot_dimension_numbers<[1], [0], [0], [1], [0, 0, 1, 1], [], []>} : vector<8x8xf32>, vector<8x16xf32>, vector<8x16xf32> -> vector<8x16xf32>
    %117 = tpu.concatenate %107, %110, %113, %116 in 1 : vector<8x16xf32>, vector<8x16xf32>, vector<8x16xf32>, vector<8x16xf32> -> vector<8x64xf32>
    %118 = tpu.concatenate %104, %117 in 0 : vector<8x64xf32>, vector<8x64xf32> -> vector<16x64xf32>
    %cst_42 = arith.constant dense<0.000000e+00> : vector<16x64xf32>
    %119 = tpu.matmul %118, %55, %cst_42 {dimension_numbers = #tpu.dot_dimension_numbers<[1], [0], [0], [1], [0, 0, 1, 1], [], []>} : vector<16x64xf32>, vector<64x64xf32>, vector<16x64xf32> -> vector<16x64xf32>
    %c0_43 = arith.constant 0 : index
    %c0_44 = arith.constant 0 : index
    %c256_45 = arith.constant 256 : index
    %120 = vector.load %arg6[%c0_43, %c0_44, %c256_45] : memref<2x1x1152xf32, #tpu.memory_space<vmem>>, vector<1x1x64xf32>
    %121 = vector.shape_cast %120 : vector<1x1x64xf32> to vector<1x64xf32>
    %122 = vector.broadcast %121 : vector<1x64xf32> to vector<16x64xf32>
    %123 = arith.addf %119, %122 : vector<16x64xf32>
    %124 = arith.addf %123, %46 : vector<16x64xf32>
    %c0_46 = arith.constant 0 : index
    %c0_47 = arith.constant 0 : index
    %c384 = arith.constant 384 : index
    %125 = vector.load %arg6[%c0_46, %c0_47, %c384] : memref<2x1x1152xf32, #tpu.memory_space<vmem>>, vector<1x1x64xf32>
    %126 = vector.shape_cast %125 : vector<1x1x64xf32> to vector<1x64xf32>
    %c0_48 = arith.constant 0 : index
    %c0_49 = arith.constant 0 : index
    %c512 = arith.constant 512 : index
    %127 = vector.load %arg6[%c0_48, %c0_49, %c512] : memref<2x1x1152xf32, #tpu.memory_space<vmem>>, vector<1x1x64xf32>
    %128 = vector.shape_cast %127 : vector<1x1x64xf32> to vector<1x64xf32>
    %cst_50 = arith.constant dense<0.000000e+00> : vector<16xf32>
    %129 = vector.multi_reduction <add>, %124, %cst_50 [1] : vector<16x64xf32> to vector<16xf32>
    %130 = vector.shape_cast %129 : vector<16xf32> to vector<16x1xf32>
    %cst_51 = arith.constant 6.400000e+01 : f32
    %131 = vector.broadcast %cst_51 : f32 to vector<16x1xf32>
    %132 = arith.divf %130, %131 : vector<16x1xf32>
    %133 = arith.mulf %124, %124 : vector<16x64xf32>
    %cst_52 = arith.constant dense<0.000000e+00> : vector<16xf32>
    %134 = vector.multi_reduction <add>, %133, %cst_52 [1] : vector<16x64xf32> to vector<16xf32>
    %135 = vector.shape_cast %134 : vector<16xf32> to vector<16x1xf32>
    %cst_53 = arith.constant 6.400000e+01 : f32
    %136 = vector.broadcast %cst_53 : f32 to vector<16x1xf32>
    %137 = arith.divf %135, %136 : vector<16x1xf32>
    %138 = arith.mulf %132, %132 : vector<16x1xf32>
    %139 = arith.subf %137, %138 : vector<16x1xf32>
    %140 = vector.broadcast %132 : vector<16x1xf32> to vector<16x64xf32>
    %141 = arith.subf %124, %140 : vector<16x64xf32>
    %cst_54 = arith.constant 9.99999996E-13 : f32
    %142 = vector.broadcast %cst_54 : f32 to vector<16x1xf32>
    %143 = arith.addf %139, %142 : vector<16x1xf32>
    %144 = math.rsqrt %143 : vector<16x1xf32>
    %145 = vector.broadcast %144 : vector<16x1xf32> to vector<16x64xf32>
    %146 = arith.mulf %141, %145 : vector<16x64xf32>
    %147 = vector.broadcast %126 : vector<1x64xf32> to vector<16x64xf32>
    %148 = arith.mulf %146, %147 : vector<16x64xf32>
    %149 = vector.broadcast %128 : vector<1x64xf32> to vector<16x64xf32>
    %150 = arith.addf %148, %149 : vector<16x64xf32>
    %c0_55 = arith.constant 0 : index
    %c0_56 = arith.constant 0 : index
    %c384_57 = arith.constant 384 : index
    %151 = vector.load %arg4[%c0_55, %c0_56, %c384_57] : memref<2x64x512xf32, #tpu.memory_space<vmem>>, vector<1x64x128xf32>
    %152 = vector.shape_cast %151 : vector<1x64x128xf32> to vector<64x128xf32>
    %cst_58 = arith.constant dense<0.000000e+00> : vector<16x128xf32>
    %153 = tpu.matmul %150, %152, %cst_58 {dimension_numbers = #tpu.dot_dimension_numbers<[1], [0], [0], [1], [0, 0, 1, 1], [], []>} : vector<16x64xf32>, vector<64x128xf32>, vector<16x128xf32> -> vector<16x128xf32>
    %c0_59 = arith.constant 0 : index
    %c0_60 = arith.constant 0 : index
    %c640 = arith.constant 640 : index
    %154 = vector.load %arg6[%c0_59, %c0_60, %c640] : memref<2x1x1152xf32, #tpu.memory_space<vmem>>, vector<1x1x128xf32>
    %155 = vector.shape_cast %154 : vector<1x1x128xf32> to vector<1x128xf32>
    %156 = vector.broadcast %155 : vector<1x128xf32> to vector<16x128xf32>
    %157 = arith.addf %153, %156 : vector<16x128xf32>
    %cst_61 = arith.constant 5.000000e-01 : f32
    %158 = vector.broadcast %cst_61 : f32 to vector<16x128xf32>
    %159 = arith.mulf %158, %157 : vector<16x128xf32>
    %cst_62 = arith.constant 4.471500e-02 : f32
    %160 = vector.broadcast %cst_62 : f32 to vector<16x128xf32>
    %161 = arith.mulf %160, %157 : vector<16x128xf32>
    %162 = arith.mulf %161, %157 : vector<16x128xf32>
    %163 = arith.mulf %162, %157 : vector<16x128xf32>
    %164 = arith.addf %157, %163 : vector<16x128xf32>
    %cst_63 = arith.constant 0.797884583 : f32
    %165 = vector.broadcast %cst_63 : f32 to vector<16x128xf32>
    %166 = arith.mulf %165, %164 : vector<16x128xf32>
    %167 = math.tanh %166 : vector<16x128xf32>
    %cst_64 = arith.constant 1.000000e+00 : f32
    %168 = vector.broadcast %cst_64 : f32 to vector<16x128xf32>
    %169 = arith.addf %168, %167 : vector<16x128xf32>
    %170 = arith.mulf %159, %169 : vector<16x128xf32>
    %c0_65 = arith.constant 0 : index
    %c0_66 = arith.constant 0 : index
    %c0_67 = arith.constant 0 : index
    %171 = vector.load %arg5[%c0_65, %c0_66, %c0_67] : memref<2x128x64xf32, #tpu.memory_space<vmem>>, vector<1x128x64xf32>
    %172 = vector.shape_cast %171 : vector<1x128x64xf32> to vector<128x64xf32>
    %cst_68 = arith.constant dense<0.000000e+00> : vector<16x64xf32>
    %173 = tpu.matmul %170, %172, %cst_68 {dimension_numbers = #tpu.dot_dimension_numbers<[1], [0], [0], [1], [0, 0, 1, 1], [], []>} : vector<16x128xf32>, vector<128x64xf32>, vector<16x64xf32> -> vector<16x64xf32>
    %c0_69 = arith.constant 0 : index
    %c0_70 = arith.constant 0 : index
    %c768 = arith.constant 768 : index
    %174 = vector.load %arg6[%c0_69, %c0_70, %c768] : memref<2x1x1152xf32, #tpu.memory_space<vmem>>, vector<1x1x64xf32>
    %175 = vector.shape_cast %174 : vector<1x1x64xf32> to vector<1x64xf32>
    %176 = vector.broadcast %175 : vector<1x64xf32> to vector<16x64xf32>
    %177 = arith.addf %173, %176 : vector<16x64xf32>
    %178 = arith.addf %177, %150 : vector<16x64xf32>
    %c0_71 = arith.constant 0 : index
    %c0_72 = arith.constant 0 : index
    %c896 = arith.constant 896 : index
    %179 = vector.load %arg6[%c0_71, %c0_72, %c896] : memref<2x1x1152xf32, #tpu.memory_space<vmem>>, vector<1x1x64xf32>
    %180 = vector.shape_cast %179 : vector<1x1x64xf32> to vector<1x64xf32>
    %c0_73 = arith.constant 0 : index
    %c0_74 = arith.constant 0 : index
    %c1024 = arith.constant 1024 : index
    %181 = vector.load %arg6[%c0_73, %c0_74, %c1024] : memref<2x1x1152xf32, #tpu.memory_space<vmem>>, vector<1x1x64xf32>
    %182 = vector.shape_cast %181 : vector<1x1x64xf32> to vector<1x64xf32>
    %cst_75 = arith.constant dense<0.000000e+00> : vector<16xf32>
    %183 = vector.multi_reduction <add>, %178, %cst_75 [1] : vector<16x64xf32> to vector<16xf32>
    %184 = vector.shape_cast %183 : vector<16xf32> to vector<16x1xf32>
    %cst_76 = arith.constant 6.400000e+01 : f32
    %185 = vector.broadcast %cst_76 : f32 to vector<16x1xf32>
    %186 = arith.divf %184, %185 : vector<16x1xf32>
    %187 = arith.mulf %178, %178 : vector<16x64xf32>
    %cst_77 = arith.constant dense<0.000000e+00> : vector<16xf32>
    %188 = vector.multi_reduction <add>, %187, %cst_77 [1] : vector<16x64xf32> to vector<16xf32>
    %189 = vector.shape_cast %188 : vector<16xf32> to vector<16x1xf32>
    %cst_78 = arith.constant 6.400000e+01 : f32
    %190 = vector.broadcast %cst_78 : f32 to vector<16x1xf32>
    %191 = arith.divf %189, %190 : vector<16x1xf32>
    %192 = arith.mulf %186, %186 : vector<16x1xf32>
    %193 = arith.subf %191, %192 : vector<16x1xf32>
    %194 = vector.broadcast %186 : vector<16x1xf32> to vector<16x64xf32>
    %195 = arith.subf %178, %194 : vector<16x64xf32>
    %cst_79 = arith.constant 9.99999996E-13 : f32
    %196 = vector.broadcast %cst_79 : f32 to vector<16x1xf32>
    %197 = arith.addf %193, %196 : vector<16x1xf32>
    %198 = math.rsqrt %197 : vector<16x1xf32>
    %199 = vector.broadcast %198 : vector<16x1xf32> to vector<16x64xf32>
    %200 = arith.mulf %195, %199 : vector<16x64xf32>
    %201 = vector.broadcast %180 : vector<1x64xf32> to vector<16x64xf32>
    %202 = arith.mulf %200, %201 : vector<16x64xf32>
    %203 = vector.broadcast %182 : vector<1x64xf32> to vector<16x64xf32>
    %204 = arith.addf %202, %203 : vector<16x64xf32>
    %c1 = arith.constant 1 : index
    %c0_80 = arith.constant 0 : index
    %c0_81 = arith.constant 0 : index
    %205 = vector.load %arg4[%c1, %c0_80, %c0_81] : memref<2x64x512xf32, #tpu.memory_space<vmem>>, vector<1x64x192xf32>
    %206 = vector.shape_cast %205 : vector<1x64x192xf32> to vector<64x192xf32>
    %cst_82 = arith.constant dense<0.000000e+00> : vector<16x192xf32>
    %207 = tpu.matmul %204, %206, %cst_82 {dimension_numbers = #tpu.dot_dimension_numbers<[1], [0], [0], [1], [0, 0, 1, 1], [], []>} : vector<16x64xf32>, vector<64x192xf32>, vector<16x192xf32> -> vector<16x192xf32>
    %c1_83 = arith.constant 1 : index
    %c0_84 = arith.constant 0 : index
    %c0_85 = arith.constant 0 : index
    %208 = vector.load %arg6[%c1_83, %c0_84, %c0_85] : memref<2x1x1152xf32, #tpu.memory_space<vmem>>, vector<1x1x192xf32>
    %209 = vector.shape_cast %208 : vector<1x1x192xf32> to vector<1x192xf32>
    %210 = vector.broadcast %209 : vector<1x192xf32> to vector<16x192xf32>
    %211 = arith.addf %207, %210 : vector<16x192xf32>
    %c1_86 = arith.constant 1 : index
    %c0_87 = arith.constant 0 : index
    %c256_88 = arith.constant 256 : index
    %212 = vector.load %arg4[%c1_86, %c0_87, %c256_88] : memref<2x64x512xf32, #tpu.memory_space<vmem>>, vector<1x64x64xf32>
    %213 = vector.shape_cast %212 : vector<1x64x64xf32> to vector<64x64xf32>
    %214 = vector.extract_strided_slice %211 {offsets = [0, 0], sizes = [8, 16], strides = [1, 1]} : vector<16x192xf32> to vector<8x16xf32>
    %215 = vector.extract_strided_slice %211 {offsets = [0, 64], sizes = [8, 16], strides = [1, 1]} : vector<16x192xf32> to vector<8x16xf32>
    %cst_89 = arith.constant dense<0.000000e+00> : vector<8x8xf32>
    %216 = tpu.matmul %214, %215, %cst_89 {dimension_numbers = #tpu.dot_dimension_numbers<[1], [1], [0], [0], [0, 0, 1, 0], [], []>} : vector<8x16xf32>, vector<8x16xf32>, vector<8x8xf32> -> vector<8x8xf32>
    %217 = vector.extract_strided_slice %211 {offsets = [0, 16], sizes = [8, 16], strides = [1, 1]} : vector<16x192xf32> to vector<8x16xf32>
    %218 = vector.extract_strided_slice %211 {offsets = [0, 80], sizes = [8, 16], strides = [1, 1]} : vector<16x192xf32> to vector<8x16xf32>
    %cst_90 = arith.constant dense<0.000000e+00> : vector<8x8xf32>
    %219 = tpu.matmul %217, %218, %cst_90 {dimension_numbers = #tpu.dot_dimension_numbers<[1], [1], [0], [0], [0, 0, 1, 0], [], []>} : vector<8x16xf32>, vector<8x16xf32>, vector<8x8xf32> -> vector<8x8xf32>
    %220 = vector.extract_strided_slice %211 {offsets = [0, 32], sizes = [8, 16], strides = [1, 1]} : vector<16x192xf32> to vector<8x16xf32>
    %221 = vector.extract_strided_slice %211 {offsets = [0, 96], sizes = [8, 16], strides = [1, 1]} : vector<16x192xf32> to vector<8x16xf32>
    %cst_91 = arith.constant dense<0.000000e+00> : vector<8x8xf32>
    %222 = tpu.matmul %220, %221, %cst_91 {dimension_numbers = #tpu.dot_dimension_numbers<[1], [1], [0], [0], [0, 0, 1, 0], [], []>} : vector<8x16xf32>, vector<8x16xf32>, vector<8x8xf32> -> vector<8x8xf32>
    %223 = vector.extract_strided_slice %211 {offsets = [0, 48], sizes = [8, 16], strides = [1, 1]} : vector<16x192xf32> to vector<8x16xf32>
    %224 = vector.extract_strided_slice %211 {offsets = [0, 112], sizes = [8, 16], strides = [1, 1]} : vector<16x192xf32> to vector<8x16xf32>
    %cst_92 = arith.constant dense<0.000000e+00> : vector<8x8xf32>
    %225 = tpu.matmul %223, %224, %cst_92 {dimension_numbers = #tpu.dot_dimension_numbers<[1], [1], [0], [0], [0, 0, 1, 0], [], []>} : vector<8x16xf32>, vector<8x16xf32>, vector<8x8xf32> -> vector<8x8xf32>
    %226 = vector.extract_strided_slice %211 {offsets = [8, 0], sizes = [8, 16], strides = [1, 1]} : vector<16x192xf32> to vector<8x16xf32>
    %227 = vector.extract_strided_slice %211 {offsets = [8, 64], sizes = [8, 16], strides = [1, 1]} : vector<16x192xf32> to vector<8x16xf32>
    %cst_93 = arith.constant dense<0.000000e+00> : vector<8x8xf32>
    %228 = tpu.matmul %226, %227, %cst_93 {dimension_numbers = #tpu.dot_dimension_numbers<[1], [1], [0], [0], [0, 0, 1, 0], [], []>} : vector<8x16xf32>, vector<8x16xf32>, vector<8x8xf32> -> vector<8x8xf32>
    %229 = vector.extract_strided_slice %211 {offsets = [8, 16], sizes = [8, 16], strides = [1, 1]} : vector<16x192xf32> to vector<8x16xf32>
    %230 = vector.extract_strided_slice %211 {offsets = [8, 80], sizes = [8, 16], strides = [1, 1]} : vector<16x192xf32> to vector<8x16xf32>
    %cst_94 = arith.constant dense<0.000000e+00> : vector<8x8xf32>
    %231 = tpu.matmul %229, %230, %cst_94 {dimension_numbers = #tpu.dot_dimension_numbers<[1], [1], [0], [0], [0, 0, 1, 0], [], []>} : vector<8x16xf32>, vector<8x16xf32>, vector<8x8xf32> -> vector<8x8xf32>
    %232 = vector.extract_strided_slice %211 {offsets = [8, 32], sizes = [8, 16], strides = [1, 1]} : vector<16x192xf32> to vector<8x16xf32>
    %233 = vector.extract_strided_slice %211 {offsets = [8, 96], sizes = [8, 16], strides = [1, 1]} : vector<16x192xf32> to vector<8x16xf32>
    %cst_95 = arith.constant dense<0.000000e+00> : vector<8x8xf32>
    %234 = tpu.matmul %232, %233, %cst_95 {dimension_numbers = #tpu.dot_dimension_numbers<[1], [1], [0], [0], [0, 0, 1, 0], [], []>} : vector<8x16xf32>, vector<8x16xf32>, vector<8x8xf32> -> vector<8x8xf32>
    %235 = vector.extract_strided_slice %211 {offsets = [8, 48], sizes = [8, 16], strides = [1, 1]} : vector<16x192xf32> to vector<8x16xf32>
    %236 = vector.extract_strided_slice %211 {offsets = [8, 112], sizes = [8, 16], strides = [1, 1]} : vector<16x192xf32> to vector<8x16xf32>
    %cst_96 = arith.constant dense<0.000000e+00> : vector<8x8xf32>
    %237 = tpu.matmul %235, %236, %cst_96 {dimension_numbers = #tpu.dot_dimension_numbers<[1], [1], [0], [0], [0, 0, 1, 0], [], []>} : vector<8x16xf32>, vector<8x16xf32>, vector<8x8xf32> -> vector<8x8xf32>
    %238 = tpu.concatenate %216, %219, %222, %225, %228, %231, %234, %237 in 0 : vector<8x8xf32>, vector<8x8xf32>, vector<8x8xf32>, vector<8x8xf32>, vector<8x8xf32>, vector<8x8xf32>, vector<8x8xf32>, vector<8x8xf32> -> vector<64x8xf32>
    %239 = arith.addf %238, %24 : vector<64x8xf32>
    %cst_97 = arith.constant dense<0xFF800000> : vector<64xf32>
    %240 = vector.multi_reduction <maximumf>, %239, %cst_97 [1] : vector<64x8xf32> to vector<64xf32>
    %241 = vector.shape_cast %240 : vector<64xf32> to vector<64x1xf32>
    %242 = vector.broadcast %241 : vector<64x1xf32> to vector<64x8xf32>
    %243 = arith.subf %239, %242 : vector<64x8xf32>
    %244 = math.exp %243 : vector<64x8xf32>
    %cst_98 = arith.constant dense<0.000000e+00> : vector<64xf32>
    %245 = vector.multi_reduction <add>, %244, %cst_98 [1] : vector<64x8xf32> to vector<64xf32>
    %246 = vector.shape_cast %245 : vector<64xf32> to vector<64x1xf32>
    %247 = tpu.reciprocal %246 {approx = true} : vector<64x1xf32> -> vector<64x1xf32>
    %248 = vector.broadcast %247 : vector<64x1xf32> to vector<64x8xf32>
    %249 = arith.mulf %244, %248 : vector<64x8xf32>
    %250 = vector.extract_strided_slice %249 {offsets = [0, 0], sizes = [8, 8], strides = [1, 1]} : vector<64x8xf32> to vector<8x8xf32>
    %251 = vector.extract_strided_slice %211 {offsets = [0, 128], sizes = [8, 16], strides = [1, 1]} : vector<16x192xf32> to vector<8x16xf32>
    %cst_99 = arith.constant dense<0.000000e+00> : vector<8x16xf32>
    %252 = tpu.matmul %250, %251, %cst_99 {dimension_numbers = #tpu.dot_dimension_numbers<[1], [0], [0], [1], [0, 0, 1, 1], [], []>} : vector<8x8xf32>, vector<8x16xf32>, vector<8x16xf32> -> vector<8x16xf32>
    %253 = vector.extract_strided_slice %249 {offsets = [8, 0], sizes = [8, 8], strides = [1, 1]} : vector<64x8xf32> to vector<8x8xf32>
    %254 = vector.extract_strided_slice %211 {offsets = [0, 144], sizes = [8, 16], strides = [1, 1]} : vector<16x192xf32> to vector<8x16xf32>
    %cst_100 = arith.constant dense<0.000000e+00> : vector<8x16xf32>
    %255 = tpu.matmul %253, %254, %cst_100 {dimension_numbers = #tpu.dot_dimension_numbers<[1], [0], [0], [1], [0, 0, 1, 1], [], []>} : vector<8x8xf32>, vector<8x16xf32>, vector<8x16xf32> -> vector<8x16xf32>
    %256 = vector.extract_strided_slice %249 {offsets = [16, 0], sizes = [8, 8], strides = [1, 1]} : vector<64x8xf32> to vector<8x8xf32>
    %257 = vector.extract_strided_slice %211 {offsets = [0, 160], sizes = [8, 16], strides = [1, 1]} : vector<16x192xf32> to vector<8x16xf32>
    %cst_101 = arith.constant dense<0.000000e+00> : vector<8x16xf32>
    %258 = tpu.matmul %256, %257, %cst_101 {dimension_numbers = #tpu.dot_dimension_numbers<[1], [0], [0], [1], [0, 0, 1, 1], [], []>} : vector<8x8xf32>, vector<8x16xf32>, vector<8x16xf32> -> vector<8x16xf32>
    %259 = vector.extract_strided_slice %249 {offsets = [24, 0], sizes = [8, 8], strides = [1, 1]} : vector<64x8xf32> to vector<8x8xf32>
    %260 = vector.extract_strided_slice %211 {offsets = [0, 176], sizes = [8, 16], strides = [1, 1]} : vector<16x192xf32> to vector<8x16xf32>
    %cst_102 = arith.constant dense<0.000000e+00> : vector<8x16xf32>
    %261 = tpu.matmul %259, %260, %cst_102 {dimension_numbers = #tpu.dot_dimension_numbers<[1], [0], [0], [1], [0, 0, 1, 1], [], []>} : vector<8x8xf32>, vector<8x16xf32>, vector<8x16xf32> -> vector<8x16xf32>
    %262 = tpu.concatenate %252, %255, %258, %261 in 1 : vector<8x16xf32>, vector<8x16xf32>, vector<8x16xf32>, vector<8x16xf32> -> vector<8x64xf32>
    %263 = vector.extract_strided_slice %249 {offsets = [32, 0], sizes = [8, 8], strides = [1, 1]} : vector<64x8xf32> to vector<8x8xf32>
    %264 = vector.extract_strided_slice %211 {offsets = [8, 128], sizes = [8, 16], strides = [1, 1]} : vector<16x192xf32> to vector<8x16xf32>
    %cst_103 = arith.constant dense<0.000000e+00> : vector<8x16xf32>
    %265 = tpu.matmul %263, %264, %cst_103 {dimension_numbers = #tpu.dot_dimension_numbers<[1], [0], [0], [1], [0, 0, 1, 1], [], []>} : vector<8x8xf32>, vector<8x16xf32>, vector<8x16xf32> -> vector<8x16xf32>
    %266 = vector.extract_strided_slice %249 {offsets = [40, 0], sizes = [8, 8], strides = [1, 1]} : vector<64x8xf32> to vector<8x8xf32>
    %267 = vector.extract_strided_slice %211 {offsets = [8, 144], sizes = [8, 16], strides = [1, 1]} : vector<16x192xf32> to vector<8x16xf32>
    %cst_104 = arith.constant dense<0.000000e+00> : vector<8x16xf32>
    %268 = tpu.matmul %266, %267, %cst_104 {dimension_numbers = #tpu.dot_dimension_numbers<[1], [0], [0], [1], [0, 0, 1, 1], [], []>} : vector<8x8xf32>, vector<8x16xf32>, vector<8x16xf32> -> vector<8x16xf32>
    %269 = vector.extract_strided_slice %249 {offsets = [48, 0], sizes = [8, 8], strides = [1, 1]} : vector<64x8xf32> to vector<8x8xf32>
    %270 = vector.extract_strided_slice %211 {offsets = [8, 160], sizes = [8, 16], strides = [1, 1]} : vector<16x192xf32> to vector<8x16xf32>
    %cst_105 = arith.constant dense<0.000000e+00> : vector<8x16xf32>
    %271 = tpu.matmul %269, %270, %cst_105 {dimension_numbers = #tpu.dot_dimension_numbers<[1], [0], [0], [1], [0, 0, 1, 1], [], []>} : vector<8x8xf32>, vector<8x16xf32>, vector<8x16xf32> -> vector<8x16xf32>
    %272 = vector.extract_strided_slice %249 {offsets = [56, 0], sizes = [8, 8], strides = [1, 1]} : vector<64x8xf32> to vector<8x8xf32>
    %273 = vector.extract_strided_slice %211 {offsets = [8, 176], sizes = [8, 16], strides = [1, 1]} : vector<16x192xf32> to vector<8x16xf32>
    %cst_106 = arith.constant dense<0.000000e+00> : vector<8x16xf32>
    %274 = tpu.matmul %272, %273, %cst_106 {dimension_numbers = #tpu.dot_dimension_numbers<[1], [0], [0], [1], [0, 0, 1, 1], [], []>} : vector<8x8xf32>, vector<8x16xf32>, vector<8x16xf32> -> vector<8x16xf32>
    %275 = tpu.concatenate %265, %268, %271, %274 in 1 : vector<8x16xf32>, vector<8x16xf32>, vector<8x16xf32>, vector<8x16xf32> -> vector<8x64xf32>
    %276 = tpu.concatenate %262, %275 in 0 : vector<8x64xf32>, vector<8x64xf32> -> vector<16x64xf32>
    %cst_107 = arith.constant dense<0.000000e+00> : vector<16x64xf32>
    %277 = tpu.matmul %276, %213, %cst_107 {dimension_numbers = #tpu.dot_dimension_numbers<[1], [0], [0], [1], [0, 0, 1, 1], [], []>} : vector<16x64xf32>, vector<64x64xf32>, vector<16x64xf32> -> vector<16x64xf32>
    %c1_108 = arith.constant 1 : index
    %c0_109 = arith.constant 0 : index
    %c256_110 = arith.constant 256 : index
    %278 = vector.load %arg6[%c1_108, %c0_109, %c256_110] : memref<2x1x1152xf32, #tpu.memory_space<vmem>>, vector<1x1x64xf32>
    %279 = vector.shape_cast %278 : vector<1x1x64xf32> to vector<1x64xf32>
    %280 = vector.broadcast %279 : vector<1x64xf32> to vector<16x64xf32>
    %281 = arith.addf %277, %280 : vector<16x64xf32>
    %282 = arith.addf %281, %204 : vector<16x64xf32>
    %c1_111 = arith.constant 1 : index
    %c0_112 = arith.constant 0 : index
    %c384_113 = arith.constant 384 : index
    %283 = vector.load %arg6[%c1_111, %c0_112, %c384_113] : memref<2x1x1152xf32, #tpu.memory_space<vmem>>, vector<1x1x64xf32>
    %284 = vector.shape_cast %283 : vector<1x1x64xf32> to vector<1x64xf32>
    %c1_114 = arith.constant 1 : index
    %c0_115 = arith.constant 0 : index
    %c512_116 = arith.constant 512 : index
    %285 = vector.load %arg6[%c1_114, %c0_115, %c512_116] : memref<2x1x1152xf32, #tpu.memory_space<vmem>>, vector<1x1x64xf32>
    %286 = vector.shape_cast %285 : vector<1x1x64xf32> to vector<1x64xf32>
    %cst_117 = arith.constant dense<0.000000e+00> : vector<16xf32>
    %287 = vector.multi_reduction <add>, %282, %cst_117 [1] : vector<16x64xf32> to vector<16xf32>
    %288 = vector.shape_cast %287 : vector<16xf32> to vector<16x1xf32>
    %cst_118 = arith.constant 6.400000e+01 : f32
    %289 = vector.broadcast %cst_118 : f32 to vector<16x1xf32>
    %290 = arith.divf %288, %289 : vector<16x1xf32>
    %291 = arith.mulf %282, %282 : vector<16x64xf32>
    %cst_119 = arith.constant dense<0.000000e+00> : vector<16xf32>
    %292 = vector.multi_reduction <add>, %291, %cst_119 [1] : vector<16x64xf32> to vector<16xf32>
    %293 = vector.shape_cast %292 : vector<16xf32> to vector<16x1xf32>
    %cst_120 = arith.constant 6.400000e+01 : f32
    %294 = vector.broadcast %cst_120 : f32 to vector<16x1xf32>
    %295 = arith.divf %293, %294 : vector<16x1xf32>
    %296 = arith.mulf %290, %290 : vector<16x1xf32>
    %297 = arith.subf %295, %296 : vector<16x1xf32>
    %298 = vector.broadcast %290 : vector<16x1xf32> to vector<16x64xf32>
    %299 = arith.subf %282, %298 : vector<16x64xf32>
    %cst_121 = arith.constant 9.99999996E-13 : f32
    %300 = vector.broadcast %cst_121 : f32 to vector<16x1xf32>
    %301 = arith.addf %297, %300 : vector<16x1xf32>
    %302 = math.rsqrt %301 : vector<16x1xf32>
    %303 = vector.broadcast %302 : vector<16x1xf32> to vector<16x64xf32>
    %304 = arith.mulf %299, %303 : vector<16x64xf32>
    %305 = vector.broadcast %284 : vector<1x64xf32> to vector<16x64xf32>
    %306 = arith.mulf %304, %305 : vector<16x64xf32>
    %307 = vector.broadcast %286 : vector<1x64xf32> to vector<16x64xf32>
    %308 = arith.addf %306, %307 : vector<16x64xf32>
    %c1_122 = arith.constant 1 : index
    %c0_123 = arith.constant 0 : index
    %c384_124 = arith.constant 384 : index
    %309 = vector.load %arg4[%c1_122, %c0_123, %c384_124] : memref<2x64x512xf32, #tpu.memory_space<vmem>>, vector<1x64x128xf32>
    %310 = vector.shape_cast %309 : vector<1x64x128xf32> to vector<64x128xf32>
    %cst_125 = arith.constant dense<0.000000e+00> : vector<16x128xf32>
    %311 = tpu.matmul %308, %310, %cst_125 {dimension_numbers = #tpu.dot_dimension_numbers<[1], [0], [0], [1], [0, 0, 1, 1], [], []>} : vector<16x64xf32>, vector<64x128xf32>, vector<16x128xf32> -> vector<16x128xf32>
    %c1_126 = arith.constant 1 : index
    %c0_127 = arith.constant 0 : index
    %c640_128 = arith.constant 640 : index
    %312 = vector.load %arg6[%c1_126, %c0_127, %c640_128] : memref<2x1x1152xf32, #tpu.memory_space<vmem>>, vector<1x1x128xf32>
    %313 = vector.shape_cast %312 : vector<1x1x128xf32> to vector<1x128xf32>
    %314 = vector.broadcast %313 : vector<1x128xf32> to vector<16x128xf32>
    %315 = arith.addf %311, %314 : vector<16x128xf32>
    %cst_129 = arith.constant 5.000000e-01 : f32
    %316 = vector.broadcast %cst_129 : f32 to vector<16x128xf32>
    %317 = arith.mulf %316, %315 : vector<16x128xf32>
    %cst_130 = arith.constant 4.471500e-02 : f32
    %318 = vector.broadcast %cst_130 : f32 to vector<16x128xf32>
    %319 = arith.mulf %318, %315 : vector<16x128xf32>
    %320 = arith.mulf %319, %315 : vector<16x128xf32>
    %321 = arith.mulf %320, %315 : vector<16x128xf32>
    %322 = arith.addf %315, %321 : vector<16x128xf32>
    %cst_131 = arith.constant 0.797884583 : f32
    %323 = vector.broadcast %cst_131 : f32 to vector<16x128xf32>
    %324 = arith.mulf %323, %322 : vector<16x128xf32>
    %325 = math.tanh %324 : vector<16x128xf32>
    %cst_132 = arith.constant 1.000000e+00 : f32
    %326 = vector.broadcast %cst_132 : f32 to vector<16x128xf32>
    %327 = arith.addf %326, %325 : vector<16x128xf32>
    %328 = arith.mulf %317, %327 : vector<16x128xf32>
    %c1_133 = arith.constant 1 : index
    %c0_134 = arith.constant 0 : index
    %c0_135 = arith.constant 0 : index
    %329 = vector.load %arg5[%c1_133, %c0_134, %c0_135] : memref<2x128x64xf32, #tpu.memory_space<vmem>>, vector<1x128x64xf32>
    %330 = vector.shape_cast %329 : vector<1x128x64xf32> to vector<128x64xf32>
    %cst_136 = arith.constant dense<0.000000e+00> : vector<16x64xf32>
    %331 = tpu.matmul %328, %330, %cst_136 {dimension_numbers = #tpu.dot_dimension_numbers<[1], [0], [0], [1], [0, 0, 1, 1], [], []>} : vector<16x128xf32>, vector<128x64xf32>, vector<16x64xf32> -> vector<16x64xf32>
    %c1_137 = arith.constant 1 : index
    %c0_138 = arith.constant 0 : index
    %c768_139 = arith.constant 768 : index
    %332 = vector.load %arg6[%c1_137, %c0_138, %c768_139] : memref<2x1x1152xf32, #tpu.memory_space<vmem>>, vector<1x1x64xf32>
    %333 = vector.shape_cast %332 : vector<1x1x64xf32> to vector<1x64xf32>
    %334 = vector.broadcast %333 : vector<1x64xf32> to vector<16x64xf32>
    %335 = arith.addf %331, %334 : vector<16x64xf32>
    %336 = arith.addf %335, %308 : vector<16x64xf32>
    %c1_140 = arith.constant 1 : index
    %c0_141 = arith.constant 0 : index
    %c896_142 = arith.constant 896 : index
    %337 = vector.load %arg6[%c1_140, %c0_141, %c896_142] : memref<2x1x1152xf32, #tpu.memory_space<vmem>>, vector<1x1x64xf32>
    %338 = vector.shape_cast %337 : vector<1x1x64xf32> to vector<1x64xf32>
    %c1_143 = arith.constant 1 : index
    %c0_144 = arith.constant 0 : index
    %c1024_145 = arith.constant 1024 : index
    %339 = vector.load %arg6[%c1_143, %c0_144, %c1024_145] : memref<2x1x1152xf32, #tpu.memory_space<vmem>>, vector<1x1x64xf32>
    %340 = vector.shape_cast %339 : vector<1x1x64xf32> to vector<1x64xf32>
    %cst_146 = arith.constant dense<0.000000e+00> : vector<16xf32>
    %341 = vector.multi_reduction <add>, %336, %cst_146 [1] : vector<16x64xf32> to vector<16xf32>
    %342 = vector.shape_cast %341 : vector<16xf32> to vector<16x1xf32>
    %cst_147 = arith.constant 6.400000e+01 : f32
    %343 = vector.broadcast %cst_147 : f32 to vector<16x1xf32>
    %344 = arith.divf %342, %343 : vector<16x1xf32>
    %345 = arith.mulf %336, %336 : vector<16x64xf32>
    %cst_148 = arith.constant dense<0.000000e+00> : vector<16xf32>
    %346 = vector.multi_reduction <add>, %345, %cst_148 [1] : vector<16x64xf32> to vector<16xf32>
    %347 = vector.shape_cast %346 : vector<16xf32> to vector<16x1xf32>
    %cst_149 = arith.constant 6.400000e+01 : f32
    %348 = vector.broadcast %cst_149 : f32 to vector<16x1xf32>
    %349 = arith.divf %347, %348 : vector<16x1xf32>
    %350 = arith.mulf %344, %344 : vector<16x1xf32>
    %351 = arith.subf %349, %350 : vector<16x1xf32>
    %352 = vector.broadcast %344 : vector<16x1xf32> to vector<16x64xf32>
    %353 = arith.subf %336, %352 : vector<16x64xf32>
    %cst_150 = arith.constant 9.99999996E-13 : f32
    %354 = vector.broadcast %cst_150 : f32 to vector<16x1xf32>
    %355 = arith.addf %351, %354 : vector<16x1xf32>
    %356 = math.rsqrt %355 : vector<16x1xf32>
    %357 = vector.broadcast %356 : vector<16x1xf32> to vector<16x64xf32>
    %358 = arith.mulf %353, %357 : vector<16x64xf32>
    %359 = vector.broadcast %338 : vector<1x64xf32> to vector<16x64xf32>
    %360 = arith.mulf %358, %359 : vector<16x64xf32>
    %361 = vector.broadcast %340 : vector<1x64xf32> to vector<16x64xf32>
    %362 = arith.addf %360, %361 : vector<16x64xf32>
    %c0_151 = arith.constant 0 : index
    %c0_152 = arith.constant 0 : index
    %363 = vector.load %arg7[%c0_151, %c0_152] : memref<65x128xf32, #tpu.memory_space<vmem>>, vector<64x128xf32>
    %cst_153 = arith.constant dense<0.000000e+00> : vector<16x128xf32>
    %364 = tpu.matmul %362, %363, %cst_153 {dimension_numbers = #tpu.dot_dimension_numbers<[1], [0], [0], [1], [0, 0, 1, 1], [], []>} : vector<16x64xf32>, vector<64x128xf32>, vector<16x128xf32> -> vector<16x128xf32>
    %c64 = arith.constant 64 : index
    %c0_154 = arith.constant 0 : index
    %365 = vector.load %arg7[%c64, %c0_154] : memref<65x128xf32, #tpu.memory_space<vmem>>, vector<1x128xf32>
    %366 = vector.broadcast %365 : vector<1x128xf32> to vector<16x128xf32>
    %367 = arith.addf %364, %366 : vector<16x128xf32>
    %c0_155 = arith.constant 0 : index
    %c0_156 = arith.constant 0 : index
    %368 = vector.load %arg8[%c0_155, %c0_156] : memref<16x128xf32, #tpu.memory_space<vmem>>, vector<16x128xf32>
    tpu.vector_store %arg8[%c0_155, %c0_156], %367 {strides = array<i32>} : memref<16x128xf32, #tpu.memory_space<vmem>>, vector<16x128xf32>,
    return
  }
  func.func @transform_0(%arg0: i32) -> (i32, i32) {
    %c0_i32 = arith.constant 0 : i32
    %c0_i32_0 = arith.constant 0 : i32
    %c0_i32_1 = arith.constant 0 : i32
    return %c0_i32, %c0_i32_0 : i32, i32
  }
  func.func @transform_1(%arg0: i32) -> (i32, i32) {
    %c0_i32 = arith.constant 0 : i32
    %c0_i32_0 = arith.constant 0 : i32
    %c0_i32_1 = arith.constant 0 : i32
    return %c0_i32, %c0_i32_0 : i32, i32
  }
  func.func @transform_2(%arg0: i32) -> (i32, i32) {
    %c0_i32 = arith.constant 0 : i32
    %c0_i32_0 = arith.constant 0 : i32
    %c0_i32_1 = arith.constant 0 : i32
    return %c0_i32, %c0_i32_0 : i32, i32
  }
  func.func @transform_3(%arg0: i32) -> (i32, i32, i32) {
    %c0_i32 = arith.constant 0 : i32
    %c0_i32_0 = arith.constant 0 : i32
    %c0_i32_1 = arith.constant 0 : i32
    %c0_i32_2 = arith.constant 0 : i32
    return %c0_i32, %c0_i32_0, %c0_i32_1 : i32, i32, i32
  }
  func.func @transform_4(%arg0: i32) -> (i32, i32, i32) {
    %c0_i32 = arith.constant 0 : i32
    %c0_i32_0 = arith.constant 0 : i32
    %c0_i32_1 = arith.constant 0 : i32
    %c0_i32_2 = arith.constant 0 : i32
    return %c0_i32, %c0_i32_0, %c0_i32_1 : i32, i32, i32
  }
  func.func @transform_5(%arg0: i32) -> (i32, i32, i32) {
    %c0_i32 = arith.constant 0 : i32
    %c0_i32_0 = arith.constant 0 : i32
    %c0_i32_1 = arith.constant 0 : i32
    %c0_i32_2 = arith.constant 0 : i32
    return %c0_i32, %c0_i32_0, %c0_i32_1 : i32, i32, i32
  }
  func.func @transform_6(%arg0: i32) -> (i32, i32) {
    %c0_i32 = arith.constant 0 : i32
    %c0_i32_0 = arith.constant 0 : i32
    %c0_i32_1 = arith.constant 0 : i32
    return %c0_i32, %c0_i32_0 : i32, i32
  }
  func.func @transform_7(%arg0: i32) -> (i32, i32) {
    %c0_i32 = arith.constant 0 : i32
    %c0_i32_0 = arith.constant 0 : i32
    %c0_i32_1 = arith.constant 0 : i32
    return %c0_i32, %c0_i32_0 : i32, i32
  }
}

</mosaic_0001>

<bundles_post_ra>
// kernel: news_classifier_forward.1
= control target key start
LH: loop header
LB: loop body
LE: loop exit
PB: predicated region body
PF: predicated region fallthrough
CT: control target
= control target key end

     0   :  { %v5007_v0 = vmov 0   ;;  %v5008_v9 = vmov 0.0   ;;  %v28_v23 = vlaneseq  ;;  %vm57_vm0 = vcmask 850944   ;;  %s5010_s23 = smov 16   ;;  %s5011_s24 = smov 64   ;;  %s5898_s0 = inlined_call_operand.vmem [shape: s32[16,1], index: 0, kind: input, shape index: {}]   ;;  %s5899_s2 = inlined_call_operand.vmem [shape: f32[122,64], index: 2, kind: input, shape index: {}]   ;;  %s5900_s3 = inlined_call_operand.vmem [shape: f32[2,64,512], index: 3, kind: input, shape index: {}]   ;;  %s5901_s5 = inlined_call_operand.vmem [shape: f32[2,1,1152], index: 5, kind: input, shape index: {}]   ;;  %s5902_s1 = inlined_call_operand.vmem [shape: s32[2,8], index: 1, kind: input, shape index: {}]   ;;  %s5903_s4 = inlined_call_operand.vmem [shape: f32[2,128,64], index: 4, kind: input, shape index: {}]   ;;  %s5904_s6 = inlined_call_operand.vmem [shape: f32[65,128], index: 6, kind: input, shape index: {}]   ;;  %s5905_s7 = inlined_call_operand.vmem [shape: f32[16,128], index: 7, kind: output, shape index: {}]  }
   0x1   :  { %4914 = vset.pattern.permute.xlu0 %v5007_v0  ;;  %v26_v1 = vld [vmem:[%s5898_s0] sm:$0xff]  ;;  %v43_v3 = vld [vmem:[%s5899_s2 + $0x8] sm:$0xff]  ;;  %v44_v4 = vld [vmem:[%s5899_s2 + $0x10] sm:$0xff]  ;;  %295 = vmatprep.mubr.f32.mxu1 %v5008_v9  ;;  %vm153_vm3 = vcmask 523264   ;;  %vm5009_vm4 = vmmov 0   ;;  %s5012_s25 = smov 48  }
   0x2   :  { %v42_v2 = vld [vmem:[%s5899_s2] sm:$0xff]  ;;  %31 = vperm.xlu0 %4914, %v26_v1   ;;  %v45_v5 = vld [vmem:[%s5899_s2 + $0x18] sm:$0xff]  ;;  %v27_v6 = vld [vmem:[%s5898_s0 + $0x8] sm:$0xff]  ;;  %v29_v24 = vand.u32 127, %v28_v23  ;;  %s5013_s26 = smov 32   ;;  %s5014_s27 = smov 112  }
   0x3   :  { %v4704_v7 = vpack.c.bf16 %v43_v3, %v42_v2  ;;  %v4708_v8 = vpack.c.bf16 %v45_v5, %v44_v4  ;;  %v46_v10 = vld [vmem:[%s5899_s2 + $0x20] sm:$0xff]  ;;  %v47_v11 = vld [vmem:[%s5899_s2 + $0x28] sm:$0xff]  ;;  %v48_v13 = vld [vmem:[%s5899_s2 + $0x30] sm:$0xff]  ;;  %s5015_s28 = smov 96   ;;  %s5016_s29 = smov 80   ;;  %vm319_vm5 = vcmask 130048  }
   0x4   :  { %v4712_v12 = vpack.c.bf16 %v47_v11, %v46_v10  ;;  %v49_v14 = vld [vmem:[%s5899_s2 + $0x38] sm:$0xff]  ;;  %v50_v16 = vld [vmem:[%s5899_s2 + $0x40] sm:$0xff]  ;;  %v51_v17 = vld [vmem:[%s5899_s2 + $0x48] sm:$0xff]  ;;  %vm947_vm6 = vcmask 64512   ;;  %vm1351_vm7 = vcmask 261120   ;;  %vm1353_vm8 = vcmask 392192  }
   0x5   :  { %4705 = vmatprep.subr.bf16.mxu0 %v4704_v7  ;;  %v4716_v15 = vpack.c.bf16 %v49_v14, %v48_v13  ;;  %v4720_v18 = vpack.c.bf16 %v51_v17, %v50_v16  ;;  %v52_v19 = vld [vmem:[%s5899_s2 + $0x50] sm:$0xff]  ;;  %v53_v20 = vld [vmem:[%s5899_s2 + $0x58] sm:$0xff]  ;;  %v54_v22 = vld [vmem:[%s5899_s2 + $0x60] sm:$0xff] }
   0x6   :  { %34 = vperm.xlu0 %4914, %v27_v6   ;;  %4707 = vmatpush3.bf16.msra.mxu0 %v4704_v7  ;;  %v4724_v21 = vpack.c.bf16 %v53_v20, %v52_v19  ;;  %v56_v29 = vld [vmem:[%s5899_s2 + $0x70] sm:$0xff]  ;;  %v55_v30 = vld [vmem:[%s5899_s2 + $0x68] sm:$0xff]  ;;  %v197_v44 = vld [vmem:[%s5900_s3] sm:$0xff] }
   0x7   :  { %4709 = vmatprep.subr.bf16.mxu0 %v4708_v8  ;;  %v198_v41 = vld [vmem:[%s5900_s3 + $0x8] sm:$0xff]  ;;  %v199_v45 = vld [vmem:[%s5900_s3 + $0x20] sm:$0xff]  ;;  %v4051_v20 = vld [vmem:[%s5899_s2 + $0x79] ss:$0 sm:$0xff] }
   0x8   :  { %v200_v42 = vld [vmem:[%s5900_s3 + $0x28] sm:$0xff]  ;;  %v4730_v46 = vpack.c.bf16 %v199_v45, %v197_v44  ;;  %v201_v50 = vld [vmem:[%s5900_s3 + $0x40] sm:$0xff] }
   0x9   :  { %v4728_v43 = vpack.c.bf16 %v200_v42, %v198_v41  ;;  %v202_v47 = vld [vmem:[%s5900_s3 + $0x48] sm:$0xff]  ;;  %v203_v51 = vld [vmem:[%s5900_s3 + $0x60] sm:$0xff] }
   0xa   :  { %4711 = vmatpush3.bf16.msra.mxu0 %v4708_v8  ;;  %v204_v48 = vld [vmem:[%s5900_s3 + $0x68] sm:$0xff]  ;;  %v4734_v52 = vpack.c.bf16 %v203_v51, %v201_v50  ;;  %v205_v55 = vld [vmem:[%s5900_s3 + $0x80] sm:$0xff] }
   0xb   :  { %4713 = vmatprep.subr.bf16.mxu0 %v4712_v12  ;;  %4729 = vmatprep.subr.bf16.mxu1 %v4728_v43  ;;  %v4732_v49 = vpack.c.bf16 %v204_v48, %v202_v47  ;;  %v206_v53 = vld [vmem:[%s5900_s3 + $0x88] sm:$0xff]  ;;  %v207_v57 = vld [vmem:[%s5900_s3 + $0xa0] sm:$0xff] }
   0xc   :  { %4731 = vmatpush1.bf16.msra.mxu1 %v4730_v46  ;;  %v208_v54 = vld [vmem:[%s5900_s3 + $0xa8] sm:$0xff]  ;;  %v4738_v60 = vpack.c.bf16 %v207_v57, %v205_v55  ;;  %v209_v62 = vld [vmem:[%s5900_s3 + $0xc0] sm:$0xff] }
   0xd   :  { %4733 = vmatprep.subr.bf16.mxu1 %v4732_v49  ;;  %v4736_v56 = vpack.c.bf16 %v208_v54, %v206_v53  ;;  %v210_v58 = vld [vmem:[%s5900_s3 + $0xc8] sm:$0xff]  ;;  %v211_v63 = vld [vmem:[%s5900_s3 + $0xe0] sm:$0xff] }
   0xe   :  { %4715 = vmatpush3.bf16.msra.mxu0 %v4712_v12  ;;  %v212_v59 = vld [vmem:[%s5900_s3 + $0xe8] sm:$0xff]  ;;  %v4742_v0 = vpack.c.bf16 %v211_v63, %v209_v62 }
   0xf   :  { %4717 = vmatprep.subr.bf16.mxu0 %v4716_v15  ;;  %v4740_v61 = vpack.c.bf16 %v212_v59, %v210_v58 }
  0x10   :  { %4735 = vmatpush1.bf16.msra.mxu1 %v4734_v52 }
  0x11   :  { %4737 = vmatprep.subr.bf16.mxu1 %v4736_v56  ;;  %v141_v56 = vld [vmem:[%s5902_s1] sm:$0x3] }
  0x12   :  { %4719 = vmatpush3.bf16.msra.mxu0 %v4716_v15  ;;  %v142_v57 = vcvt.s32.f32 %v141_v56 }
  0x13   :  { %4721 = vmatprep.subr.bf16.mxu0 %v4720_v18 }
  0x14   :  { %4739 = vmatpush1.bf16.msra.mxu1 %v4738_v60  ;;  %v143_v58 = vsub.f32 1.0, %v142_v57 }
  0x15   :  { %4741 = vmatprep.subr.bf16.mxu1 %v4740_v61 }
  0x16   :  { %4723 = vmatpush3.bf16.msra.mxu0 %v4720_v18  ;;  %v4050_v18 = vld [vmem:[%s5899_s2 + $0x78] ss:$0 sm:$0xff]  ;;  %v144_v59 = vmul.f32 -1e+09, %v143_v58 }
  0x17   :  { %4725 = vmatprep.subr.bf16.mxu0 %v4724_v21 }
  0x18   :  { %4743 = vmatpush1.bf16.msra.mxu1 %v4742_v0 }
  0x19   :  { %4394 = vmatprep.subr.mxu1 %v5008_v9 }
  0x1a   :  { %4727 = vmatpush3.bf16.msra.mxu0 %v4724_v21 }
  0x1b   :  { %4374 = vmatprep.subr.mxu0 %v54_v22 }
  0x1e   :  { %4375 = vmatpush3.msra.mxu0 %v54_v22 }
  0x1f   :  { %4379 = vmatprep.subr.mxu0 %v5008_v9 }
  0x81   :  { %v32_v25 = vpop.permute.xlu0 %31 }
  0x82   :  { %vm36_vm1 = vcmp.eq.s32.totalorder %v29_v24, %v32_v25 }
  0x83   :  { %v4046_v26 = vsel %vm36_vm1, 1.0, %v5008_v9 }
  0x84   :  { %4376 = vmatprep.mubr.msk.f32.mxu0 %vm57_vm0, %v4046_v26 }
  0x85   :  { %v35_v27 = vpop.permute.xlu0 %34 }
  0x86   :  { %vm37_vm2 = vcmp.eq.s32.totalorder %v29_v24, %v35_v27 }
  0x87   :  { %v4047_v28 = vsel %vm37_vm2, 1.0, %v5008_v9 }
  0x88   :  { %4377 = vmatmul.mubr.msk.f32.vlgmr.msra.gmra.mrb[0].mxu0 %vm57_vm0, %v4047_v28 }
  0x89   :  { %4381 = vmatprep.mubr.msk.f32.mxu0 %vm5009_vm4, %v5008_v9 }
 0x15b   :  { %v4378_v31 = vpop.f32.mrb[0].mxu0 }
 0x15c   :  { %v5113_v32 = vadd.f32 %v4378_v31, %v56_v29  ;;  %v130_v33 = vpop.f32.mrb[1].mxu0  ;;  %v146_v29 = vshrl.u32 %v28_v23, 7  ;;  %v213_v31 = vld [vmem:[%s5901_s5] sm:$0x3] }
 0x15d   :  { %v5115_v34 = vadd.f32 %v130_v33, %v55_v30 }
 0x15e   :  { %v157_v35 = vsel %vm153_vm3, %v5113_v32, 0.0  ;;  %v164_v39 = vmul.f32 %v5113_v32, %v5113_v32  ;;  %v5198_v30 = vsub.s32 0, %v146_v29 }
 0x15f   :  { %158 = vadd.xlane.f32.xlu0 %v157_v35  ;;  %v154_v36 = vsel %vm153_vm3, %v5115_v34, 0.0  ;;  %v163_v37 = vmul.f32 %v5115_v34, %v5115_v34 }
 0x160   :  { %155 = vadd.xlane.f32.xlu1 %v154_v36  ;;  %v168_v40 = vsel %vm153_vm3, %v164_v39, 0.0  ;;  %v5271_v60 = vrot.slane %v144_v59, %v5198_v30 }
 0x161   :  { %v165_v38 = vsel %vm153_vm3, %v163_v37, 0.0 }
 0x164   :  { %166 = vadd.xlane.f32.xlu1 %v165_v38 }
 0x168   :  { %169 = vadd.xlane.f32.xlu1 %v168_v40 }
 0x1ec   :  { %v159_v3 = vpop.xlane.xlu0 %158 }
 0x1ed   :  { %v156_v1 = vpop.xlane.xlu1 %155  ;;  %v162_v5 = vmul.f32 0.015625, %v159_v3 }
 0x1ee   :  { %v161_v2 = vmul.f32 0.015625, %v156_v1 }
 0x1ef   :  { %v174_v11 = vmul.f32 %v162_v5, %v162_v5  ;;  %v178_v21 = vsub.f32 %v5113_v32, %v162_v5  ;;  %v218_v32 = vrot.slane %v213_v31, %v5198_v30 }
 0x1f0   :  { %v173_v6 = vmul.f32 %v161_v2, %v161_v2  ;;  %v177_v16 = vsub.f32 %v5115_v34, %v161_v2  ;;  %v5204_v34 = vsub.s32 1, %v146_v29 }
 0x1f1   :  { %v167_v4 = vpop.xlane.xlu1 %166 }
 0x1f2   :  { %v171_v7 = vmul.f32 0.015625, %v167_v4  ;;  %v222_v36 = vrot.slane %v213_v31, %v5204_v34 }
 0x1f4   :  { %v175_v8 = vsub.f32 %v171_v7, %v173_v6 }
 0x1f5   :  { %v170_v10 = vpop.xlane.xlu1 %169 }
 0x1f6   :  { %v179_v12 = vadd.f32 1e-12, %v175_v8  ;;  %v172_v13 = vmul.f32 0.015625, %v170_v10 }
 0x1f8   :  { %4915 = vrsqrt.f32 %v179_v12  ;;  %v176_v14 = vsub.f32 %v172_v13, %v174_v11 }
 0x1fa   :  { %v180_v15 = vadd.f32 1e-12, %v176_v14  ;;  %v5282_v14 = vrot.slane %v144_v59, %v5204_v34 }
 0x1fc   :  { %4917 = vrsqrt.f32 %v180_v15 }
 0x202   :  { %v4916_v17 = vpop.eup %4915 }
 0x203   :  { %v183_v19 = vmul.f32 %v4916_v17, %v177_v16 }
 0x205   :  { %v189_v22 = vmul.f32 %v4050_v18, %v183_v19 }
 0x206   :  { %v4918_v24 = vpop.eup %4917 }
 0x207   :  { %v5184_v25 = vadd.f32 %v4051_v20, %v189_v22  ;;  %v184_v26 = vmul.f32 %v4918_v24, %v178_v21 }
 0x209   :  { %4052 = vmatmul.mubr.msk.f32.vlgmr.msra.gmra.mrb[0].mxu1 %vm153_vm3, %v5184_v25  ;;  %v190_v27 = vmul.f32 %v4050_v18, %v184_v26 }
 0x20a   :  { %301 = vmatprep.mubr.f32.mxu1 %v5008_v9 }
 0x20b   :  { %v5189_v28 = vadd.f32 %v4051_v20, %v190_v27 }
 0x20d   :  { %4053 = vmatmul.mubr.msk.f32.gmra.mrb[2].mxu1 %vm153_vm3, %v5189_v28 }
 0x20e   :  { %4396 = vmatprep.mubr.msk.f32.mxu1 %vm5009_vm4, %v5008_v9 }
 0x2dc   :  { %v297_v33 = vpop.f32.mrb[0].mxu1 }
 0x2dd   :  { %v298_v35 = vadd.f32 %v297_v33, %v218_v32  ;;  %v299_v23 = vpop.f32.mrb[1].mxu1 }
 0x2de   :  { %v5251_v51 = vadd.f32 %v299_v23, %v222_v36 }
 0x2df   :  { %552 = vrot.lane.b32.xlu0 %v298_v35, %s5010_s23  ;;  %317 = vrot.lane.b32.xlu1 %v298_v35, %s5011_s24 }
 0x2e0   :  { %v303_v37 = vpop.f32.mrb[2].mxu1 }
 0x2e1   :  { %v304_v38 = vadd.f32 %v303_v37, %v218_v32  ;;  %v305_v39 = vpop.f32.mrb[3].mxu1 }
 0x2e2   :  { %v5209_v40 = vadd.f32 %v305_v39, %v222_v36 }
 0x2e3   :  { %396 = vrot.lane.b32.xlu1 %v298_v35, %s5012_s25  ;;  %785 = vrot.lane.b32.xlu0 %v304_v38, %s5013_s26 }
 0x2e7   :  { %394 = vrot.lane.b32.xlu1 %v298_v35, %s5014_s27  ;;  %783 = vrot.lane.b32.xlu0 %v304_v38, %s5015_s28 }
 0x2eb   :  { %474 = vrot.lane.b32.xlu1 %v298_v35, %s5013_s26 }
 0x2ef   :  { %472 = vrot.lane.b32.xlu1 %v298_v35, %s5015_s28 }
 0x2f3   :  { %550 = vrot.lane.b32.xlu1 %v298_v35, %s5016_s29 }
 0x2f7   :  { %629 = vrot.lane.b32.xlu1 %v304_v38, %s5011_s24 }
 0x2fb   :  { %707 = vrot.lane.b32.xlu1 %v304_v38, %s5012_s25 }
 0x2ff   :  { %705 = vrot.lane.b32.xlu1 %v304_v38, %s5014_s27 }
 0x303   :  { %863 = vrot.lane.b32.xlu1 %v304_v38, %s5010_s23 }
 0x307   :  { %861 = vrot.lane.b32.xlu1 %v304_v38, %s5016_s29 }
 0x351   :  { %v553_v41 = vpop.permute.xlu0 %552  ;;  %v318_v42 = vpop.permute.xlu1 %317 }
 0x352   :  { %4380 = vmatpush3.xpose.msk.msra.mxu0 %vm319_vm5, %v318_v42  ;;  %4395 = vmatpush3.xpose.msk.msra.mxu1 %vm319_vm5, %v553_v41 }
 0x353   :  { %4384 = vmatprep.subr.mxu0 %v5008_v9  ;;  %4404 = vmatprep.subr.mxu1 %v5008_v9 }
 0x355   :  { %4382 = vmatmul.mubr.msk.f32.vlgmr.msra.gmra.mrb[2].mxu0 %vm319_vm5, %v298_v35  ;;  %v397_v43 = vpop.permute.xlu1 %396  ;;  %v786_v49 = vpop.permute.xlu0 %785 }
 0x356   :  { %4385 = vmatpush3.xpose.msk.msra.mxu0 %vm319_vm5, %v397_v43  ;;  %4386 = vmatprep.mubr.msk.f32.mxu0 %vm5009_vm4, %v5008_v9 }
 0x357   :  { %4389 = vmatprep.subr.mxu0 %v5008_v9 }
 0x359   :  { %v395_v44 = vpop.permute.xlu1 %394  ;;  %v784_v52 = vpop.permute.xlu0 %783 }
 0x35a   :  { %4387 = vmatmul.mubr.msk.f32.vlgmr.msra.gmra.mrb[4].mxu0 %vm319_vm5, %v395_v44 }
 0x35b   :  { %4391 = vmatprep.mubr.msk.f32.mxu0 %vm5009_vm4, %v5008_v9 }
 0x35d   :  { %v475_v45 = vpop.permute.xlu1 %474 }
 0x35e   :  { %4390 = vmatpush3.xpose.msk.msra.mxu0 %vm319_vm5, %v475_v45 }
 0x35f   :  { %4399 = vmatprep.subr.mxu0 %v5008_v9 }
 0x361   :  { %v473_v46 = vpop.permute.xlu1 %472 }
 0x362   :  { %4392 = vmatmul.mubr.msk.f32.vlgmr.msra.gmra.mrb[6].mxu0 %vm319_vm5, %v473_v46 }
 0x363   :  { %4401 = vmatprep.mubr.msk.f32.mxu0 %vm5009_vm4, %v5008_v9 }
 0x365   :  { %v551_v47 = vpop.permute.xlu1 %550 }
 0x366   :  { %4397 = vmatmul.mubr.msk.f32.vlgmr.msra.gmra.mrb[4].mxu1 %vm319_vm5, %v551_v47 }
 0x367   :  { %4406 = vmatprep.mubr.msk.f32.mxu1 %vm5009_vm4, %v5008_v9 }
 0x369   :  { %v630_v48 = vpop.permute.xlu1 %629 }
 0x36a   :  { %4400 = vmatpush3.xpose.msk.msra.mxu0 %vm319_vm5, %v630_v48 }
 0x36b   :  { %4409 = vmatprep.subr.mxu0 %v5008_v9 }
 0x36d   :  { %4402 = vmatmul.mubr.msk.f32.vlgmr.msra.gmra.mrb[8].mxu0 %vm319_vm5, %v304_v38  ;;  %v708_v50 = vpop.permute.xlu1 %707 }
 0x36e   :  { %4405 = vmatpush3.xpose.msk.msra.mxu1 %vm319_vm5, %v708_v50  ;;  %4410 = vmatpush3.xpose.msk.msra.mxu0 %vm319_vm5, %v786_v49 }
 0x36f   :  { %4411 = vmatprep.mubr.msk.f32.mxu0 %vm5009_vm4, %v5008_v9  ;;  %4419 = vmatprep.subr.mxu0 %v5008_v9 }
 0x370   :  { %4414 = vmatprep.subr.mxu1 %v5008_v9 }
 0x371   :  { %4412 = vmatmul.mubr.msk.f32.vlgmr.msra.gmra.mrb[10].mxu0 %vm319_vm5, %v784_v52  ;;  %v706_v53 = vpop.permute.xlu1 %705 }
 0x372   :  { %4407 = vmatmul.mubr.msk.f32.vlgmr.msra.gmra.mrb[6].mxu1 %vm319_vm5, %v706_v53  ;;  %4420 = vmatpush3.msra.mxu0 %v5251_v51 }
 0x373   :  { %4416 = vmatprep.mubr.msk.f32.mxu1 %vm5009_vm4, %v5008_v9  ;;  %4421 = vmatprep.mubr.msk.f32.mxu0 %vm5009_vm4, %v5008_v9 }
 0x374   :  { %4429 = vmatprep.subr.mxu0 %v5008_v9 }
 0x375   :  { %v864_v54 = vpop.permute.xlu1 %863 }
 0x376   :  { %4415 = vmatpush3.xpose.msk.msra.mxu1 %vm319_vm5, %v864_v54 }
 0x377   :  { %4424 = vmatprep.subr.mxu1 %v5008_v9 }
 0x379   :  { %v862_v55 = vpop.permute.xlu1 %861 }
 0x37a   :  { %4417 = vmatmul.mubr.msk.f32.vlgmr.msra.gmra.mrb[8].mxu1 %vm319_vm5, %v862_v55 }
 0x37b   :  { %4426 = vmatprep.mubr.msk.f32.mxu1 %vm5009_vm4, %v5008_v9 }
 0x428   :  { %v390_v61 = vpop.f32.mrb[2].mxu0 }
 0x429   :  { %v939_v62 = vadd.f32 %v390_v61, %v5271_v60  ;;  %v4383_v63 = vpop.f32.mrb[3].mxu0 }
 0x42b   :  { %v948_v0 = vsel %vm947_vm6, %v939_v62, -inf }
 0x42c   :  { %949 = vmax.xlane.f32.xlu0 %v948_v0 }
 0x42d   :  { %v468_v1 = vpop.f32.mrb[4].mxu0 }
 0x42e   :  { %v940_v2 = vadd.f32 %v468_v1, %v5271_v60  ;;  %v4388_v3 = vpop.f32.mrb[5].mxu0 }
 0x430   :  { %v951_v4 = vsel %vm947_vm6, %v940_v2, -inf }
 0x431   :  { %952 = vmax.xlane.f32.xlu1 %v951_v4 }
 0x435   :  { %v546_v5 = vpop.f32.mrb[6].mxu0 }
 0x436   :  { %v941_v6 = vadd.f32 %v546_v5, %v5271_v60  ;;  %v4393_v7 = vpop.f32.mrb[7].mxu0 }
 0x438   :  { %v954_v8 = vsel %vm947_vm6, %v941_v6, -inf }
 0x439   :  { %955 = vmax.xlane.f32.xlu0 %v954_v8  ;;  %v624_v10 = vpop.f32.mrb[4].mxu1 }
 0x43a   :  { %v942_v11 = vadd.f32 %v624_v10, %v5271_v60  ;;  %v4398_v12 = vpop.f32.mrb[5].mxu1 }
 0x43c   :  { %v957_v13 = vsel %vm947_vm6, %v942_v11, -inf }
 0x43d   :  { %958 = vmax.xlane.f32.xlu0 %v957_v13 }
 0x440   :  { %v701_v15 = vpop.f32.mrb[8].mxu0 }
 0x441   :  { %v943_v16 = vadd.f32 %v701_v15, %v5282_v14  ;;  %v4403_v17 = vpop.f32.mrb[9].mxu0 }
 0x443   :  { %v960_v18 = vsel %vm947_vm6, %v943_v16, -inf }
 0x444   :  { %961 = vmax.xlane.f32.xlu1 %v960_v18  ;;  %v857_v19 = vpop.f32.mrb[10].mxu0 }
 0x445   :  { %v945_v20 = vadd.f32 %v857_v19, %v5282_v14  ;;  %v779_v21 = vpop.f32.mrb[6].mxu1  ;;  %v4413_v22 = vpop.f32.mrb[11].mxu0 }
 0x446   :  { %v944_v24 = vadd.f32 %v779_v21, %v5282_v14  ;;  %v4408_v26 = vpop.f32.mrb[7].mxu1 }
 0x447   :  { %v966_v27 = vsel %vm947_vm6, %v945_v20, -inf }
 0x448   :  { %967 = vmax.xlane.f32.xlu1 %v966_v27  ;;  %v963_v29 = vsel %vm947_vm6, %v944_v24, -inf }
 0x449   :  { %964 = vmax.xlane.f32.xlu0 %v963_v29 }
 0x44d   :  { %v935_v31 = vpop.f32.mrb[8].mxu1 }
 0x44e   :  { %v946_v32 = vadd.f32 %v935_v31, %v5282_v14  ;;  %v4418_v33 = vpop.f32.mrb[9].mxu1 }
 0x450   :  { %v969_v35 = vsel %vm947_vm6, %v946_v32, -inf }
 0x451   :  { %970 = vmax.xlane.f32.xlu0 %v969_v35 }
 0x459   :  { %1110 = vrot.lane.b32.xlu1 %v5251_v51, %s5014_s27 }
 0x45d   :  { %1262 = vrot.lane.b32.xlu1 %v5251_v51, %s5016_s29 }
 0x461   :  { %1429 = vrot.lane.b32.xlu1 %v5209_v40, %s5014_s27 }
 0x467   :  { %1186 = vrot.lane.b32.xlu0 %v5251_v51, %s5015_s28 }
 0x4b9   :  { %v950_v23 = vpop.xlane.xlu0 %949 }
 0x4ba   :  { %v972_v36 = vsub.f32 %v939_v62, %v950_v23 }
 0x4bc   :  { %v980_v37 = vmul.f32 1.442695, %v972_v36 }
 0x4be   :  { %4919 = vpow2.f32 %v980_v37  ;;  %v953_v38 = vpop.xlane.xlu1 %952 }
 0x4bf   :  { %v973_v43 = vsub.f32 %v940_v2, %v953_v38 }
 0x4c1   :  { %v982_v48 = vmul.f32 1.442695, %v973_v43 }
 0x4c6   :  { %v956_v39 = vpop.xlane.xlu0 %955 }
 0x4c7   :  { %v974_v41 = vsub.f32 %v941_v6, %v956_v39 }
 0x4c8   :  { %v4920_v42 = vpop.eup %4919 }
 0x4c9   :  { %v984_v44 = vmul.f32 1.442695, %v974_v41  ;;  %v996_v45 = vsel %vm947_vm6, %v4920_v42, 0.0 }
 0x4ca   :  { %v959_v46 = vpop.xlane.xlu0 %958  ;;  %997 = vadd.xlane.f32.xlu1 %v996_v45 }
 0x4cb   :  { %4921 = vpow2.f32 %v984_v44  ;;  %v975_v47 = vsub.f32 %v942_v11, %v959_v46 }
 0x4cd   :  { %v986_v49 = vmul.f32 1.442695, %v975_v47 }
 0x4cf   :  { %4923 = vpow2.f32 %v986_v49 }
 0x4d0   :  { %4925 = vpow2.f32 %v982_v48 }
 0x4d1   :  { %v962_v50 = vpop.xlane.xlu1 %961 }
 0x4d2   :  { %v976_v51 = vsub.f32 %v943_v16, %v962_v50 }
 0x4d4   :  { %v988_v52 = vmul.f32 1.442695, %v976_v51  ;;  %v308_v51 = vld [vmem:[%s5900_s3 + $0x10] sm:$0xff] }
 0x4d5   :  { %v4922_v53 = vpop.eup %4921  ;;  %v968_v54 = vpop.xlane.xlu1 %967 }
 0x4d6   :  { %4927 = vpow2.f32 %v988_v52  ;;  %v978_v55 = vsub.f32 %v945_v20, %v968_v54  ;;  %v965_v56 = vpop.xlane.xlu0 %964  ;;  %v1002_v57 = vsel %vm947_vm6, %v4922_v53, 0.0  ;;  %v309_v52 = vld [vmem:[%s5900_s3 + $0x30] sm:$0xff] }
 0x4d7   :  { %v977_v58 = vsub.f32 %v944_v24, %v965_v56  ;;  %1003 = vadd.xlane.f32.xlu1 %v1002_v57  ;;  %v310_v54 = vld [vmem:[%s5900_s3 + $0x50] sm:$0xff] }
 0x4d8   :  { %v992_v59 = vmul.f32 1.442695, %v978_v55  ;;  %v311_v55 = vld [vmem:[%s5900_s3 + $0x70] sm:$0xff] }
 0x4d9   :  { %v5302_v61 = vpop.eup %4923  ;;  %v990_v62 = vmul.f32 1.442695, %v977_v58  ;;  %v1111_v63 = vpop.permute.xlu1 %1110  ;;  %v4748_v57 = vpack.c.bf16 %v311_v55, %v310_v54  ;;  %v1924_v55 = vld [vmem:[%s5903_s4] sm:$0xff] }
 0x4da   :  { %4929 = vpow2.f32 %v992_v59  ;;  %4425 = vmatpush3.msra.mxu1 %v1111_v63  ;;  %v1005_v0 = vsel %vm947_vm6, %v5302_v61, 0.0  ;;  %v4926_v1 = vpop.eup %4925  ;;  %v312_v59 = vld [vmem:[%s5900_s3 + $0x90] sm:$0xff] }
 0x4db   :  { %4931 = vpow2.f32 %v990_v62  ;;  %1006 = vadd.xlane.f32.xlu0 %v1005_v0  ;;  %4434 = vmatprep.subr.mxu1 %v5008_v9  ;;  %v999_v3 = vsel %vm947_vm6, %v4926_v1, 0.0  ;;  %v314_v63 = vld [vmem:[%s5900_s3 + $0xd0] sm:$0xff] }
 0x4dc   :  { %v315_v0 = vld [vmem:[%s5900_s3 + $0xf0] sm:$0xff] }
 0x4dd   :  { %v1263_v16 = vpop.permute.xlu1 %1262 }
 0x4de   :  { %v971_v2 = vpop.xlane.xlu0 %970 }
 0x4df   :  { %v979_v4 = vsub.f32 %v946_v32, %v971_v2  ;;  %1000 = vadd.xlane.f32.xlu0 %v999_v3  ;;  %v4756_v2 = vpack.c.bf16 %v315_v0, %v314_v63 }
 0x4e0   :  { %v4928_v5 = vpop.eup %4927 }
 0x4e1   :  { %v994_v6 = vmul.f32 1.442695, %v979_v4  ;;  %v1008_v7 = vsel %vm947_vm6, %v4928_v5, 0.0  ;;  %v1430_v17 = vpop.permute.xlu1 %1429 }
 0x4e2   :  { %1009 = vadd.xlane.f32.xlu1 %v1008_v7  ;;  %v1187_v21 = vpop.permute.xlu0 %1186 }
 0x4e3   :  { %4933 = vpow2.f32 %v994_v6 }
 0x4e4   :  { %v4930_v8 = vpop.eup %4929 }
 0x4e5   :  { %v4932_v10 = vpop.eup %4931  ;;  %v1014_v11 = vsel %vm947_vm6, %v4930_v8, 0.0 }
 0x4e6   :  { %1015 = vadd.xlane.f32.xlu1 %v1014_v11  ;;  %v1011_v12 = vsel %vm947_vm6, %v4932_v10, 0.0 }
 0x4e7   :  { %1012 = vadd.xlane.f32.xlu0 %v1011_v12 }
 0x4ed   :  { %v5311_v13 = vpop.eup %4933 }
 0x4ee   :  { %v1017_v15 = vsel %vm947_vm6, %v5311_v13, 0.0 }
 0x4ef   :  { %1018 = vadd.xlane.f32.xlu0 %v1017_v15 }
 0x4f7   :  { %1581 = vrot.lane.b32.xlu1 %v5209_v40, %s5016_s29 }
 0x505   :  { %1505 = vrot.lane.b32.xlu0 %v5209_v40, %s5015_s28 }
 0x557   :  { %v998_v18 = vpop.xlane.xlu1 %997 }
 0x558   :  { %4935 = vrcp.f32 %v998_v18 }
 0x562   :  { %v4936_v19 = vpop.eup %4935 }
 0x563   :  { %v1028_v20 = vmul.f32 %v4936_v19, %v4920_v42 }
 0x564   :  { %v1004_v22 = vpop.xlane.xlu1 %1003 }
 0x565   :  { %4937 = vrcp.f32 %v1004_v22  ;;  %4422 = vmatmul.mubr.msk.f32.vlgmr.msra.gmra.mrb[12].mxu0 %vm947_vm6, %v1028_v20 }
 0x566   :  { %4430 = vmatpush3.msra.mxu0 %v1187_v21  ;;  %4431 = vmatprep.mubr.msk.f32.mxu0 %vm5009_vm4, %v5008_v9 }
 0x567   :  { %4439 = vmatprep.subr.mxu0 %v5008_v9 }
 0x568   :  { %v1007_v24 = vpop.xlane.xlu0 %1006 }
 0x56c   :  { %v1001_v26 = vpop.xlane.xlu0 %1000 }
 0x56d   :  { %4939 = vrcp.f32 %v1001_v26 }
 0x56e   :  { %4941 = vrcp.f32 %v1007_v24 }
 0x56f   :  { %v4938_v27 = vpop.eup %4937  ;;  %v1010_v29 = vpop.xlane.xlu1 %1009 }
 0x570   :  { %v1030_v31 = vmul.f32 %v4938_v27, %v4922_v53  ;;  %4943 = vrcp.f32 %v1010_v29  ;;  %v4744_v53 = vpack.c.bf16 %v309_v52, %v308_v51  ;;  %v1816_v52 = vld [vmem:[%s5900_s3 + $0xd8] sm:$0xff] }
 0x572   :  { %4432 = vmatmul.mubr.msk.f32.vlgmr.msra.gmra.mrb[14].mxu0 %vm947_vm6, %v1030_v31 }
 0x573   :  { %4440 = vmatpush3.msra.mxu0 %v5209_v40  ;;  %v1016_v32 = vpop.xlane.xlu1 %1015  ;;  %4441 = vmatprep.mubr.msk.f32.mxu0 %vm5009_vm4, %v5008_v9 }
 0x574   :  { %4945 = vrcp.f32 %v1016_v32  ;;  %v1013_v33 = vpop.xlane.xlu0 %1012  ;;  %4449 = vmatprep.subr.mxu0 %v5008_v9  ;;  %v4078_v32 = vld [vmem:[%s5901_s5 + $0x2] ss:$0 sm:$0xff] }
 0x575   :  { %4947 = vrcp.f32 %v1013_v33 }
 0x577   :  { %v4940_v35 = vpop.eup %4939  ;;  %v1582_v46 = vpop.permute.xlu1 %1581 }
 0x578   :  { %v1029_v23 = vmul.f32 %v4940_v35, %v4926_v1  ;;  %v4942_v36 = vpop.eup %4941 }
 0x579   :  { %v1031_v40 = vmul.f32 %v4942_v36, %v5302_v61  ;;  %v313_v61 = vld [vmem:[%s5900_s3 + $0xb0] sm:$0xff] }
 0x57a   :  { %v4944_v37 = vpop.eup %4943  ;;  %4427 = vmatmul.mubr.msk.f32.vlgmr.msra.gmra.mrb[10].mxu1 %vm947_vm6, %v1029_v23  ;;  %v4752_v62 = vpack.c.bf16 %v313_v61, %v312_v59 }
 0x57b   :  { %v1032_v38 = vmul.f32 %v4944_v37, %v4928_v5  ;;  %4435 = vmatpush3.msra.mxu1 %v1263_v16  ;;  %4436 = vmatprep.mubr.msk.f32.mxu1 %vm5009_vm4, %v5008_v9 }
 0x57c   :  { %v1019_v39 = vpop.xlane.xlu0 %1018  ;;  %4444 = vmatprep.subr.mxu1 %v5008_v9 }
 0x57d   :  { %4949 = vrcp.f32 %v1019_v39  ;;  %4442 = vmatmul.mubr.msk.f32.vlgmr.msra.gmra.mrb[16].mxu0 %vm947_vm6, %v1032_v38 }
 0x57e   :  { %v4946_v41 = vpop.eup %4945  ;;  %4437 = vmatmul.mubr.msk.f32.vlgmr.msra.gmra.mrb[12].mxu1 %vm947_vm6, %v1031_v40  ;;  %4451 = vmatprep.mubr.msk.f32.mxu0 %vm5009_vm4, %v5008_v9 }
 0x57f   :  { %v4948_v42 = vpop.eup %4947  ;;  %v1034_v43 = vmul.f32 %v4946_v41, %v4930_v8  ;;  %4445 = vmatpush3.msra.mxu1 %v1430_v17  ;;  %4446 = vmatprep.mubr.msk.f32.mxu1 %vm5009_vm4, %v5008_v9 }
 0x580   :  { %v1033_v44 = vmul.f32 %v4948_v42, %v4932_v10  ;;  %v1506_v45 = vpop.permute.xlu0 %1505  ;;  %4454 = vmatprep.subr.mxu1 %v5008_v9 }
 0x581   :  { %4450 = vmatpush3.msra.mxu0 %v1506_v45 }
 0x582   :  { %4447 = vmatmul.mubr.msk.f32.vlgmr.msra.gmra.mrb[14].mxu1 %vm947_vm6, %v1033_v44  ;;  %4452 = vmatmul.mubr.msk.f32.vlgmr.msra.gmra.mrb[18].mxu0 %vm947_vm6, %v1034_v43 }
 0x583   :  { %4455 = vmatpush3.msra.mxu1 %v1582_v46  ;;  %4456 = vmatprep.mubr.msk.f32.mxu1 %vm5009_vm4, %v5008_v9  ;;  %v1812_v46 = vld [vmem:[%s5900_s3 + $0x58] sm:$0xff] }
 0x584   :  { %4745 = vmatprep.subr.bf16.mxu0 %v4744_v53 }
 0x585   :  { %4747 = vmatpush3.bf16.msra.mxu0 %v4744_v53  ;;  %v1817_v53 = vld [vmem:[%s5900_s3 + $0xf8] sm:$0xff] }
 0x586   :  { %4749 = vmatprep.subr.bf16.mxu0 %v4748_v57  ;;  %v4772_v54 = vpack.c.bf16 %v1817_v53, %v1816_v52 }
 0x587   :  { %v4950_v47 = vpop.eup %4949 }
 0x588   :  { %v1035_v48 = vmul.f32 %v4950_v47, %v5311_v13  ;;  %v1813_v47 = vld [vmem:[%s5900_s3 + $0x78] sm:$0xff] }
 0x589   :  { %4751 = vmatpush3.bf16.msra.mxu0 %v4748_v57 }
 0x58a   :  { %4457 = vmatmul.mubr.msk.f32.vlgmr.msra.gmra.mrb[16].mxu1 %vm947_vm6, %v1035_v48  ;;  %4753 = vmatprep.subr.bf16.mxu0 %v4752_v62  ;;  %v4764_v48 = vpack.c.bf16 %v1813_v47, %v1812_v46  ;;  %v4083_v46 = vld [vmem:[%s5901_s5 + $0x5] ss:$0 sm:$0xff] }
 0x58d   :  { %4755 = vmatpush3.bf16.msra.mxu0 %v4752_v62 }
 0x58e   :  { %4757 = vmatprep.subr.bf16.mxu0 %v4756_v2 }
 0x591   :  { %4759 = vmatpush3.bf16.msra.mxu0 %v4756_v2 }
 0x638   :  { %v1105_v49 = vpop.f32.mrb[12].mxu0 }
 0x639   :  { %v4423_v50 = vpop.f32.mrb[13].mxu0 }
 0x63a   :  { %v1815_v50 = vld [vmem:[%s5900_s3 + $0xb8] sm:$0xff] }
 0x645   :  { %v1258_v56 = vpop.f32.mrb[14].mxu0 }
 0x646   :  { %1343 = vrot.lane.b32.xlu1 %v1258_v56, %s5013_s26  ;;  %v4433_v58 = vpop.f32.mrb[15].mxu0  ;;  %v1925_v56 = vld [vmem:[%s5903_s4 + $0x8] sm:$0xff] }
 0x647   :  { %v4776_v57 = vpack.c.bf16 %v1925_v56, %v1924_v55 }
 0x649   :  { %4777 = vmatprep.subr.bf16.mxu0 %v4776_v57 }
 0x64d   :  { %v1182_v1 = vpop.f32.mrb[10].mxu1 }
 0x64e   :  { %1339 = vrot.lane.b32.xlu0 %v1182_v1, %s5010_s23  ;;  %v4428_v3 = vpop.f32.mrb[11].mxu1 }
 0x650   :  { %v1424_v4 = vpop.f32.mrb[16].mxu0 }
 0x651   :  { %v1334_v5 = vpop.f32.mrb[12].mxu1  ;;  %v4443_v6 = vpop.f32.mrb[17].mxu0 }
 0x652   :  { %v4438_v7 = vpop.f32.mrb[13].mxu1  ;;  %1347 = vrot.lane.b32.xlu1 %v1334_v5, %s5012_s25 }
 0x655   :  { %v1501_v8 = vpop.f32.mrb[14].mxu1  ;;  %v1577_v10 = vpop.f32.mrb[18].mxu0 }
 0x656   :  { %1658 = vrot.lane.b32.xlu0 %v1501_v8, %s5010_s23  ;;  %v4448_v11 = vpop.f32.mrb[15].mxu1  ;;  %v4453_v12 = vpop.f32.mrb[19].mxu0 }
 0x657   :  { %v4081_v12 = vld [vmem:[%s5901_s5 + $0x3] ss:$0 sm:$0xff] }
 0x65a   :  { %1662 = vrot.lane.b32.xlu0 %v1577_v10, %s5013_s26 }
 0x65d   :  { %v1653_v13 = vpop.f32.mrb[16].mxu1 }
 0x65e   :  { %1666 = vrot.lane.b32.xlu1 %v1653_v13, %s5012_s25  ;;  %v4458_v15 = vpop.f32.mrb[17].mxu1 }
 0x65f   :  { %v4082_v15 = vld [vmem:[%s5901_s5 + $0x4] ss:$0 sm:$0xff] }
 0x6b8   :  { %v1344_v16 = vpop.permute.xlu1 %1343 }
 0x6c0   :  { %v1340_v17 = vpop.permute.xlu0 %1339 }
 0x6c1   :  { %v1350_v18 = vsel %vm319_vm5, %v1105_v49, %v1340_v17  ;;  %v1814_v49 = vld [vmem:[%s5900_s3 + $0x98] sm:$0xff] }
 0x6c2   :  { %v1352_v19 = vsel %vm1351_vm7, %v1350_v18, %v1344_v16  ;;  %v4768_v51 = vpack.c.bf16 %v1815_v50, %v1814_v49 }
 0x6c4   :  { %v1348_v20 = vpop.permute.xlu1 %1347 }
 0x6c5   :  { %v1354_v21 = vsel %vm1353_vm8, %v1352_v19, %v1348_v20 }
 0x6c6   :  { %4475 = vmatprep.mubr.msk.f32.mxu0 %vm153_vm3, %v1354_v21 }
 0x6c8   :  { %v1659_v22 = vpop.permute.xlu0 %1658 }
 0x6c9   :  { %v1669_v26 = vsel %vm319_vm5, %v1424_v4, %v1659_v22 }
 0x6cc   :  { %v1663_v24 = vpop.permute.xlu0 %1662 }
 0x6cd   :  { %v1670_v27 = vsel %vm1351_vm7, %v1669_v26, %v1663_v24  ;;  %v1926_v24 = vld [vmem:[%s5903_s4 + $0x10] sm:$0xff]  ;;  %v1927_v26 = vld [vmem:[%s5903_s4 + $0x18] sm:$0xff] }
 0x6d0   :  { %v1667_v29 = vpop.permute.xlu1 %1666 }
 0x6d1   :  { %v1671_v31 = vsel %vm1353_vm8, %v1670_v27, %v1667_v29  ;;  %v4780_v27 = vpack.c.bf16 %v1927_v26, %v1926_v24  ;;  %v1928_v29 = vld [vmem:[%s5903_s4 + $0x20] sm:$0xff] }
 0x6d2   :  { %4476 = vmatmul.mubr.msk.f32.vlgmr.msra.gmra.mrb[20].mxu0 %vm153_vm3, %v1671_v31  ;;  %v1929_v31 = vld [vmem:[%s5903_s4 + $0x28] sm:$0xff]  ;;  %v4089_v26 = vld [vmem:[%s5900_s3 + $0x100] sm:$0xff] }
 0x6d3   :  { %4779 = vmatpush3.bf16.msra.mxu0 %v4776_v57 }
 0x6d4   :  { %4781 = vmatprep.subr.bf16.mxu0 %v4780_v27 }
 0x6d7   :  { %4783 = vmatpush3.bf16.msra.mxu0 %v4780_v27  ;;  %v4091_v27 = vld [vmem:[%s5900_s3 + $0x120] sm:$0xff] }
 0x7a5   :  { %v4477_v33 = vpop.f32.mrb[20].mxu0 }
 0x7a6   :  { %v1757_v35 = vadd.f32 %v4477_v33, %v4078_v32  ;;  %v1751_v23 = vpop.f32.mrb[21].mxu0  ;;  %v1930_v33 = vld [vmem:[%s5903_s4 + $0x30] sm:$0xff] }
 0x7a7   :  { %v1752_v36 = vadd.f32 %v4078_v32, %v1751_v23  ;;  %v4784_v32 = vpack.c.bf16 %v1929_v31, %v1928_v29  ;;  %v4810_v29 = vpack.c.bf16 %v4091_v27, %v4089_v26  ;;  %v4094_v31 = vld [vmem:[%s5900_s3 + $0x148] sm:$0xff] }
 0x7a8   :  { %v5388_v37 = vadd.f32 %v1757_v35, %v5189_v28  ;;  %v1811_v28 = vld [vmem:[%s5900_s3 + $0x38] sm:$0xff] }
 0x7a9   :  { %v1760_v38 = vadd.f32 %v1752_v36, %v5184_v25  ;;  %v1810_v25 = vld [vmem:[%s5900_s3 + $0x18] sm:$0xff]  ;;  %4785 = vmatprep.subr.bf16.mxu0 %v4784_v32  ;;  %v1932_v36 = vld [vmem:[%s5903_s4 + $0x40] sm:$0xff] }
 0x7aa   :  { %v1767_v40 = vsel %vm153_vm3, %v5388_v37, 0.0  ;;  %v1773_v43 = vmul.f32 %v5388_v37, %v5388_v37  ;;  %v4760_v45 = vpack.c.bf16 %v1811_v28, %v1810_v25  ;;  %4787 = vmatpush3.bf16.msra.mxu0 %v4784_v32  ;;  %v1931_v35 = vld [vmem:[%s5903_s4 + $0x38] sm:$0xff]  ;;  %v1938_v25 = vld [vmem:[%s5903_s4 + $0x70] sm:$0xff]  ;;  %v4096_v32 = vld [vmem:[%s5900_s3 + $0x168] sm:$0xff] }
 0x7ab   :  { %1768 = vadd.xlane.f32.xlu1 %v1767_v40  ;;  %v1764_v39 = vsel %vm153_vm3, %v1760_v38, 0.0  ;;  %v1772_v41 = vmul.f32 %v1760_v38, %v1760_v38  ;;  %v4788_v23 = vpack.c.bf16 %v1931_v35, %v1930_v33  ;;  %v1934_v40 = vld [vmem:[%s5903_s4 + $0x50] sm:$0xff]  ;;  %v1939_v28 = vld [vmem:[%s5903_s4 + $0x78] sm:$0xff]  ;;  %v4812_v33 = vpack.c.bf16 %v4096_v32, %v4094_v31  ;;  %v4093_v35 = vld [vmem:[%s5900_s3 + $0x140] sm:$0xff] }
 0x7ac   :  { %1765 = vadd.xlane.f32.xlu0 %v1764_v39  ;;  %v1777_v44 = vsel %vm153_vm3, %v1773_v43, 0.0  ;;  %4761 = vmatprep.subr.bf16.mxu1 %v4760_v45  ;;  %v1935_v39 = vld [vmem:[%s5903_s4 + $0x58] sm:$0xff]  ;;  %v1937_v43 = vld [vmem:[%s5903_s4 + $0x68] sm:$0xff] }
 0x7ad   :  { %v1774_v42 = vsel %vm153_vm3, %v1772_v41, 0.0  ;;  %4763 = vmatpush3.bf16.msra.mxu1 %v4760_v45  ;;  %4789 = vmatprep.subr.bf16.mxu0 %v4788_v23  ;;  %v4796_v41 = vpack.c.bf16 %v1935_v39, %v1934_v40  ;;  %v4804_v45 = vpack.c.bf16 %v1939_v28, %v1938_v25  ;;  %v4097_v39 = vld [vmem:[%s5900_s3 + $0x180] sm:$0xff] }
 0x7ae   :  { %4765 = vmatprep.subr.bf16.mxu1 %v4764_v48  ;;  %4791 = vmatpush3.bf16.msra.mxu0 %v4788_v23  ;;  %v4095_v23 = vld [vmem:[%s5900_s3 + $0x160] sm:$0xff] }
 0x7af   :  { %v4101_v25 = vld [vmem:[%s5900_s3 + $0x1c0] sm:$0xff] }
 0x7b0   :  { %1775 = vadd.xlane.f32.xlu0 %v1774_v42  ;;  %v1936_v42 = vld [vmem:[%s5903_s4 + $0x60] sm:$0xff] }
 0x7b1   :  { %4767 = vmatpush3.bf16.msra.mxu1 %v4764_v48 }
 0x7b2   :  { %4769 = vmatprep.subr.bf16.mxu1 %v4768_v51 }
 0x7b4   :  { %1778 = vadd.xlane.f32.xlu0 %v1777_v44  ;;  %v4800_v44 = vpack.c.bf16 %v1937_v43, %v1936_v42  ;;  %v4102_v43 = vld [vmem:[%s5900_s3 + $0x1c8] sm:$0xff] }
 0x7b5   :  { %4771 = vmatpush3.bf16.msra.mxu1 %v4768_v51 }
 0x7b6   :  { %4773 = vmatprep.subr.bf16.mxu1 %v4772_v54 }
 0x7b9   :  { %4775 = vmatpush3.bf16.msra.mxu1 %v4772_v54 }
 0x838   :  { %v1769_v61 = vpop.xlane.xlu1 %1768 }
 0x839   :  { %v1766_v58 = vpop.xlane.xlu0 %1765  ;;  %v1771_v63 = vmul.f32 0.015625, %v1769_v61 }
 0x83a   :  { %v1770_v59 = vmul.f32 0.015625, %v1766_v58 }
 0x83b   :  { %v1783_v4 = vmul.f32 %v1771_v63, %v1771_v63  ;;  %v1787_v16 = vsub.f32 %v5388_v37, %v1771_v63  ;;  %v1933_v37 = vld [vmem:[%s5903_s4 + $0x48] sm:$0xff] }
 0x83c   :  { %v1782_v0 = vmul.f32 %v1770_v59, %v1770_v59  ;;  %v1786_v10 = vsub.f32 %v1760_v38, %v1770_v59  ;;  %v4792_v38 = vpack.c.bf16 %v1933_v37, %v1932_v36  ;;  %v4814_v36 = vpack.c.bf16 %v4095_v23, %v4093_v35  ;;  %v4098_v37 = vld [vmem:[%s5900_s3 + $0x188] sm:$0xff] }
 0x83d   :  { %v1776_v62 = vpop.xlane.xlu0 %1775 }
 0x83e   :  { %v1780_v1 = vmul.f32 0.015625, %v1776_v62  ;;  %4793 = vmatprep.subr.bf16.mxu0 %v4792_v38 }
 0x83f   :  { %4795 = vmatpush3.bf16.msra.mxu0 %v4792_v38  ;;  %v4100_v38 = vld [vmem:[%s5900_s3 + $0x1a8] sm:$0xff] }
 0x840   :  { %v1784_v2 = vsub.f32 %v1780_v1, %v1782_v0  ;;  %4797 = vmatprep.subr.bf16.mxu0 %v4796_v41  ;;  %v4816_v40 = vpack.c.bf16 %v4100_v38, %v4098_v37 }
 0x841   :  { %v1779_v3 = vpop.xlane.xlu0 %1778 }
 0x842   :  { %v1788_v5 = vadd.f32 1e-12, %v1784_v2  ;;  %v1781_v6 = vmul.f32 0.015625, %v1779_v3 }
 0x843   :  { %4799 = vmatpush3.bf16.msra.mxu0 %v4796_v41  ;;  %v4099_v41 = vld [vmem:[%s5900_s3 + $0x1a0] sm:$0xff] }
 0x844   :  { %4951 = vrsqrt.f32 %v1788_v5  ;;  %v1785_v7 = vsub.f32 %v1781_v6, %v1783_v4  ;;  %4801 = vmatprep.subr.bf16.mxu0 %v4800_v44  ;;  %v4086_v6 = vld [vmem:[%s5901_s5 + $0x6] ss:$0 sm:$0xff]  ;;  %v4818_v42 = vpack.c.bf16 %v4099_v41, %v4097_v39 }
 0x846   :  { %v1789_v8 = vadd.f32 1e-12, %v1785_v7 }
 0x847   :  { %4803 = vmatpush3.bf16.msra.mxu0 %v4800_v44  ;;  %v4104_v44 = vld [vmem:[%s5900_s3 + $0x1e8] sm:$0xff] }
 0x848   :  { %4953 = vrsqrt.f32 %v1789_v8  ;;  %4805 = vmatprep.subr.bf16.mxu0 %v4804_v45  ;;  %v4820_v28 = vpack.c.bf16 %v4104_v44, %v4102_v43 }
 0x84b   :  { %4807 = vmatpush3.bf16.msra.mxu0 %v4804_v45  ;;  %v4103_v45 = vld [vmem:[%s5900_s3 + $0x1e0] sm:$0xff] }
 0x84c   :  { %4547 = vmatprep.subr.mxu0 %v5008_v9 }
 0x84e   :  { %v4952_v11 = vpop.eup %4951 }
 0x84f   :  { %v1792_v13 = vmul.f32 %v4952_v11, %v1786_v10 }
 0x851   :  { %v1800_v17 = vmul.f32 %v4081_v12, %v1792_v13 }
 0x852   :  { %v4954_v18 = vpop.eup %4953 }
 0x853   :  { %v1793_v19 = vmul.f32 %v4954_v18, %v1787_v16  ;;  %v5435_v20 = vadd.f32 %v4082_v15, %v1800_v17 }
 0x855   :  { %v1801_v21 = vmul.f32 %v4081_v12, %v1793_v19  ;;  %4494 = vmatprep.mubr.msk.f32.mxu1 %vm153_vm3, %v5435_v20 }
 0x857   :  { %v5439_v22 = vadd.f32 %v4082_v15, %v1801_v21  ;;  %v4090_v21 = vld [vmem:[%s5900_s3 + $0x108] sm:$0xff] }
 0x859   :  { %4495 = vmatmul.mubr.msk.f32.vlgmr.msra.gmra.mrb[18].mxu1 %vm153_vm3, %v5439_v22 }
 0x85a   :  { %2172 = vmatprep.mubr.f32.mxu1 %v5008_v9 }
 0x92c   :  { %v4496_v47 = vpop.f32.mrb[18].mxu1 }
 0x92d   :  { %v1903_v48 = vadd.f32 %v4496_v47, %v4083_v46  ;;  %v1897_v49 = vpop.f32.mrb[19].mxu1 }
 0x92e   :  { %v1898_v50 = vadd.f32 %v4083_v46, %v1897_v49  ;;  %v4822_v46 = vpack.c.bf16 %v4103_v45, %v4101_v25 }
 0x92f   :  { %v1909_v51 = vmul.f32 0.044715, %v1903_v48  ;;  %v1907_v3 = vmul.f32 0.5, %v1903_v48 }
 0x930   :  { %v1908_v52 = vmul.f32 0.044715, %v1898_v50  ;;  %v1906_v1 = vmul.f32 0.5, %v1898_v50 }
 0x931   :  { %v1911_v53 = vmul.f32 %v1909_v51, %v1903_v48 }
 0x932   :  { %v1910_v54 = vmul.f32 %v1908_v52, %v1898_v50 }
 0x933   :  { %v1913_v55 = vmul.f32 %v1911_v53, %v1903_v48 }
 0x934   :  { %v1912_v56 = vmul.f32 %v1910_v54, %v1898_v50 }
 0x935   :  { %v1915_v57 = vadd.f32 %v1913_v55, %v1903_v48 }
 0x936   :  { %v1914_v58 = vadd.f32 %v1912_v56, %v1898_v50 }
 0x937   :  { %v1917_v59 = vmul.f32 0.7978846, %v1915_v57 }
 0x938   :  { %v1916_v61 = vmul.f32 0.7978846, %v1914_v58 }
 0x939   :  { %4955 = vtanh.f32 %v1917_v59 }
 0x93a   :  { %4957 = vtanh.f32 %v1916_v61 }
 0x943   :  { %v4956_v62 = vpop.eup %4955 }
 0x944   :  { %v4958_v63 = vpop.eup %4957  ;;  %v1921_v0 = vadd.f32 1.0, %v4956_v62 }
 0x945   :  { %v1920_v2 = vadd.f32 1.0, %v4958_v63 }
 0x946   :  { %v1923_v5 = vmul.f32 %v1921_v0, %v1907_v3  ;;  %v4087_v0 = vld [vmem:[%s5901_s5 + $0x7] ss:$0 sm:$0xff] }
 0x947   :  { %v1922_v4 = vmul.f32 %v1920_v2, %v1906_v1  ;;  %v4088_v2 = vld [vmem:[%s5901_s5 + $0x8] ss:$0 sm:$0xff] }
 0x949   :  { %4529 = vmatprep.mubr.f32.mxu0 %v1922_v4 }
 0x94a   :  { %4530 = vmatmul.mubr.f32.vlgmr.msra.gmra.mrb[22].mxu0 %v1923_v5 }
 0x94b   :  { %4549 = vmatprep.mubr.msk.f32.mxu0 %vm5009_vm4, %v5008_v9 }
 0xa1d   :  { %v4531_v7 = vpop.f32.mrb[22].mxu0 }
 0xa1e   :  { %v2019_v8 = vadd.f32 %v4531_v7, %v4086_v6  ;;  %v2013_v10 = vpop.f32.mrb[23].mxu0 }
 0xa1f   :  { %v2014_v11 = vadd.f32 %v4086_v6, %v2013_v10 }
 0xa20   :  { %v5496_v12 = vadd.f32 %v2019_v8, %v5439_v22  ;;  %v4092_v22 = vld [vmem:[%s5900_s3 + $0x128] sm:$0xff] }
 0xa21   :  { %v5499_v13 = vadd.f32 %v2014_v11, %v5435_v20  ;;  %v4808_v24 = vpack.c.bf16 %v4092_v22, %v4090_v21  ;;  %v4105_v11 = vld [vmem:[%s5901_s5 + $0x9] sm:$0x3] }
 0xa22   :  { %v2035_v18 = vmul.f32 %v5496_v12, %v5496_v12  ;;  %v2029_v19 = vsel %vm153_vm3, %v5496_v12, 0.0 }
 0xa23   :  { %v2026_v15 = vsel %vm153_vm3, %v5499_v13, 0.0  ;;  %v2034_v16 = vmul.f32 %v5499_v13, %v5499_v13  ;;  %4809 = vmatprep.subr.bf16.mxu1 %v4808_v24 }
 0xa24   :  { %2027 = vadd.xlane.f32.xlu1 %v2026_v15  ;;  %v2039_v20 = vsel %vm153_vm3, %v2035_v18, 0.0  ;;  %4811 = vmatpush1.bf16.msra.mxu1 %v4810_v29 }
 0xa25   :  { %v2036_v17 = vsel %vm153_vm3, %v2034_v16, 0.0  ;;  %4813 = vmatprep.subr.bf16.mxu1 %v4812_v33 }
 0xa26   :  { %2037 = vadd.xlane.f32.xlu0 %v2036_v17  ;;  %v2099_v17 = vrot.slane %v4105_v11, %v5204_v34 }
 0xa28   :  { %2030 = vadd.xlane.f32.xlu1 %v2029_v19  ;;  %4815 = vmatpush1.bf16.msra.mxu1 %v4814_v36 }
 0xa29   :  { %4817 = vmatprep.subr.bf16.mxu1 %v4816_v40 }
 0xa2a   :  { %2040 = vadd.xlane.f32.xlu0 %v2039_v20 }
 0xa2c   :  { %4819 = vmatpush1.bf16.msra.mxu1 %v4818_v42 }
 0xa2d   :  { %4821 = vmatprep.subr.bf16.mxu1 %v4820_v28 }
 0xa30   :  { %4823 = vmatpush1.bf16.msra.mxu1 %v4822_v46 }
 0xa31   :  { %4532 = vmatprep.subr.mxu1 %v5008_v9 }
 0xab1   :  { %v2028_v47 = vpop.xlane.xlu1 %2027 }
 0xab2   :  { %v2032_v48 = vmul.f32 0.015625, %v2028_v47 }
 0xab3   :  { %v2038_v49 = vpop.xlane.xlu0 %2037 }
 0xab4   :  { %v2044_v50 = vmul.f32 %v2032_v48, %v2032_v48  ;;  %v2042_v51 = vmul.f32 0.015625, %v2038_v49  ;;  %v2048_v62 = vsub.f32 %v5499_v13, %v2032_v48 }
 0xab5   :  { %v2031_v52 = vpop.xlane.xlu1 %2030 }
 0xab6   :  { %v2046_v53 = vsub.f32 %v2042_v51, %v2044_v50  ;;  %v2033_v54 = vmul.f32 0.015625, %v2031_v52 }
 0xab7   :  { %v2041_v55 = vpop.xlane.xlu0 %2040 }
 0xab8   :  { %v2050_v56 = vadd.f32 1e-12, %v2046_v53  ;;  %v2045_v57 = vmul.f32 %v2033_v54, %v2033_v54  ;;  %v2043_v58 = vmul.f32 0.015625, %v2041_v55  ;;  %v2049_v3 = vsub.f32 %v5496_v12, %v2033_v54 }
 0xab9   :  { %v2095_v12 = vrot.slane %v4105_v11, %v5198_v30 }
 0xaba   :  { %4959 = vrsqrt.f32 %v2050_v56  ;;  %v2047_v59 = vsub.f32 %v2043_v58, %v2045_v57 }
 0xabc   :  { %v2051_v61 = vadd.f32 1e-12, %v2047_v59 }
 0xabe   :  { %4961 = vrsqrt.f32 %v2051_v61 }
 0xac4   :  { %v4960_v63 = vpop.eup %4959 }
 0xac5   :  { %v2054_v1 = vmul.f32 %v4960_v63, %v2048_v62 }
 0xac7   :  { %v2062_v4 = vmul.f32 %v4087_v0, %v2054_v1 }
 0xac8   :  { %v4962_v5 = vpop.eup %4961 }
 0xac9   :  { %v5568_v6 = vadd.f32 %v4088_v2, %v2062_v4  ;;  %v2055_v7 = vmul.f32 %v4962_v5, %v2049_v3 }
 0xacb   :  { %4106 = vmatmul.mubr.msk.f32.vlgmr.msra.gmra.mrb[20].mxu1 %vm153_vm3, %v5568_v6  ;;  %v2063_v8 = vmul.f32 %v4087_v0, %v2055_v7 }
 0xacc   :  { %2178 = vmatprep.mubr.f32.mxu1 %v5008_v9 }
 0xacd   :  { %v5573_v10 = vadd.f32 %v4088_v2, %v2063_v8 }
 0xacf   :  { %4107 = vmatmul.mubr.msk.f32.gmra.mrb[22].mxu1 %vm153_vm3, %v5573_v10 }
 0xad0   :  { %4534 = vmatprep.mubr.msk.f32.mxu1 %vm5009_vm4, %v5008_v9 }
 0xb9e   :  { %v2174_v13 = vpop.f32.mrb[20].mxu1 }
 0xb9f   :  { %v2175_v15 = vadd.f32 %v2174_v13, %v2095_v12  ;;  %v2176_v16 = vpop.f32.mrb[21].mxu1 }
 0xba0   :  { %v2177_v23 = vadd.f32 %v2176_v16, %v2099_v17 }
 0xba1   :  { %2272 = vrot.lane.b32.xlu0 %v2175_v15, %s5012_s25  ;;  %2194 = vrot.lane.b32.xlu1 %v2175_v15, %s5011_s24 }
 0xba2   :  { %v2180_v18 = vpop.f32.mrb[22].mxu1 }
 0xba3   :  { %v2182_v19 = vpop.f32.mrb[23].mxu1  ;;  %v2181_v30 = vadd.f32 %v2180_v18, %v2095_v12 }
 0xba4   :  { %v5586_v20 = vadd.f32 %v2182_v19, %v2099_v17 }
 0xba5   :  { %2428 = vrot.lane.b32.xlu0 %v2175_v15, %s5010_s23  ;;  %2270 = vrot.lane.b32.xlu1 %v2175_v15, %s5014_s27 }
 0xba9   :  { %2426 = vrot.lane.b32.xlu0 %v2175_v15, %s5016_s29  ;;  %2350 = vrot.lane.b32.xlu1 %v2175_v15, %s5013_s26 }
 0xbad   :  { %2348 = vrot.lane.b32.xlu1 %v2175_v15, %s5015_s28  ;;  %2583 = vrot.lane.b32.xlu0 %v2181_v30, %s5012_s25 }
 0xbb1   :  { %2661 = vrot.lane.b32.xlu0 %v2181_v30, %s5013_s26  ;;  %2505 = vrot.lane.b32.xlu1 %v2181_v30, %s5011_s24 }
 0xbb5   :  { %2659 = vrot.lane.b32.xlu0 %v2181_v30, %s5015_s28  ;;  %2581 = vrot.lane.b32.xlu1 %v2181_v30, %s5014_s27 }
 0xbb9   :  { %2739 = vrot.lane.b32.xlu1 %v2181_v30, %s5010_s23 }
 0xbbd   :  { %2737 = vrot.lane.b32.xlu1 %v2181_v30, %s5016_s29 }
 0xc13   :  { %v2273_v34 = vpop.permute.xlu0 %2272  ;;  %v2195_v21 = vpop.permute.xlu1 %2194 }
 0xc14   :  { %4533 = vmatpush3.xpose.msk.msra.mxu1 %vm319_vm5, %v2195_v21 }
 0xc15   :  { %4537 = vmatprep.subr.mxu1 %v5008_v9 }
 0xc17   :  { %v2429_v22 = vpop.permute.xlu0 %2428  ;;  %4535 = vmatmul.mubr.msk.f32.vlgmr.msra.gmra.mrb[24].mxu1 %vm319_vm5, %v2175_v15  ;;  %v2271_v24 = vpop.permute.xlu1 %2270 }
 0xc18   :  { %4538 = vmatpush3.xpose.msk.msra.mxu1 %vm319_vm5, %v2273_v34  ;;  %4548 = vmatpush3.xpose.msk.msra.mxu0 %vm319_vm5, %v2429_v22 }
 0xc19   :  { %4539 = vmatprep.mubr.msk.f32.mxu1 %vm5009_vm4, %v5008_v9  ;;  %4542 = vmatprep.subr.mxu1 %v5008_v9 }
 0xc1a   :  { %4557 = vmatprep.subr.mxu0 %v5008_v9 }
 0xc1b   :  { %v2427_v26 = vpop.permute.xlu0 %2426  ;;  %4540 = vmatmul.mubr.msk.f32.vlgmr.msra.gmra.mrb[26].mxu1 %vm319_vm5, %v2271_v24  ;;  %v2351_v27 = vpop.permute.xlu1 %2350 }
 0xc1c   :  { %4543 = vmatpush3.xpose.msk.msra.mxu1 %vm319_vm5, %v2351_v27  ;;  %4550 = vmatmul.mubr.msk.f32.vlgmr.msra.gmra.mrb[24].mxu0 %vm319_vm5, %v2427_v26 }
 0xc1d   :  { %4544 = vmatprep.mubr.msk.f32.mxu1 %vm5009_vm4, %v5008_v9  ;;  %4552 = vmatprep.subr.mxu1 %v5008_v9 }
 0xc1e   :  { %4559 = vmatprep.mubr.msk.f32.mxu0 %vm5009_vm4, %v5008_v9 }
 0xc1f   :  { %v2584_v29 = vpop.permute.xlu0 %2583  ;;  %v2349_v31 = vpop.permute.xlu1 %2348 }
 0xc20   :  { %4545 = vmatmul.mubr.msk.f32.vlgmr.msra.gmra.mrb[28].mxu1 %vm319_vm5, %v2349_v31  ;;  %4558 = vmatpush3.xpose.msk.msra.mxu0 %vm319_vm5, %v2584_v29 }
 0xc21   :  { %4554 = vmatprep.mubr.msk.f32.mxu1 %vm5009_vm4, %v5008_v9  ;;  %4567 = vmatprep.subr.mxu0 %v5008_v9 }
 0xc23   :  { %v2506_v32 = vpop.permute.xlu1 %2505  ;;  %v2662_v33 = vpop.permute.xlu0 %2661 }
 0xc24   :  { %4553 = vmatpush3.xpose.msk.msra.mxu1 %vm319_vm5, %v2506_v32 }
 0xc25   :  { %4562 = vmatprep.subr.mxu1 %v5008_v9 }
 0xc27   :  { %4555 = vmatmul.mubr.msk.f32.vlgmr.msra.gmra.mrb[30].mxu1 %vm319_vm5, %v2181_v30  ;;  %v2582_v35 = vpop.permute.xlu1 %2581  ;;  %v2660_v36 = vpop.permute.xlu0 %2659 }
 0xc28   :  { %4560 = vmatmul.mubr.msk.f32.vlgmr.msra.gmra.mrb[26].mxu0 %vm319_vm5, %v2582_v35  ;;  %4563 = vmatpush3.xpose.msk.msra.mxu1 %vm319_vm5, %v2662_v33 }
 0xc29   :  { %4564 = vmatprep.mubr.msk.f32.mxu1 %vm5009_vm4, %v5008_v9  ;;  %4572 = vmatprep.subr.mxu1 %v5008_v9 }
 0xc2a   :  { %4569 = vmatprep.mubr.msk.f32.mxu0 %vm5009_vm4, %v5008_v9 }
 0xc2b   :  { %4565 = vmatmul.mubr.msk.f32.vlgmr.msra.gmra.mrb[32].mxu1 %vm319_vm5, %v2660_v36  ;;  %v2740_v37 = vpop.permute.xlu1 %2739 }
 0xc2c   :  { %4568 = vmatpush3.xpose.msk.msra.mxu0 %vm319_vm5, %v2740_v37  ;;  %4573 = vmatpush3.msra.mxu1 %v2177_v23 }
 0xc2d   :  { %4577 = vmatprep.subr.mxu0 %v5008_v9  ;;  %4574 = vmatprep.mubr.msk.f32.mxu1 %vm5009_vm4, %v5008_v9 }
 0xc2e   :  { %4582 = vmatprep.subr.mxu1 %v5008_v9 }
 0xc2f   :  { %v2738_v38 = vpop.permute.xlu1 %2737 }
 0xc30   :  { %4570 = vmatmul.mubr.msk.f32.vlgmr.msra.gmra.mrb[28].mxu0 %vm319_vm5, %v2738_v38 }
 0xc31   :  { %4579 = vmatprep.mubr.msk.f32.mxu0 %vm5009_vm4, %v5008_v9 }
 0xcea   :  { %v2266_v40 = vpop.f32.mrb[24].mxu1 }
 0xceb   :  { %v2815_v39 = vadd.f32 %v2266_v40, %v5271_v60  ;;  %v4536_v41 = vpop.f32.mrb[25].mxu1 }
 0xced   :  { %v2823_v42 = vsel %vm947_vm6, %v2815_v39, -inf }
 0xcee   :  { %2824 = vmax.xlane.f32.xlu0 %v2823_v42  ;;  %v2344_v43 = vpop.f32.mrb[26].mxu1 }
 0xcef   :  { %v2816_v44 = vadd.f32 %v2344_v43, %v5271_v60  ;;  %v4541_v25 = vpop.f32.mrb[27].mxu1  ;;  %v2500_v28 = vpop.f32.mrb[24].mxu0 }
 0xcf0   :  { %v4551_v45 = vpop.f32.mrb[25].mxu0  ;;  %v2818_v50 = vadd.f32 %v2500_v28, %v5271_v60 }
 0xcf1   :  { %v2826_v46 = vsel %vm947_vm6, %v2816_v44, -inf }
 0xcf2   :  { %2827 = vmax.xlane.f32.xlu1 %v2826_v46  ;;  %v2832_v53 = vsel %vm947_vm6, %v2818_v50, -inf }
 0xcf3   :  { %v2422_v47 = vpop.f32.mrb[28].mxu1 }
 0xcf4   :  { %v2817_v48 = vadd.f32 %v2422_v47, %v5271_v60  ;;  %v4546_v49 = vpop.f32.mrb[29].mxu1 }
 0xcf6   :  { %v2829_v51 = vsel %vm947_vm6, %v2817_v48, -inf }
 0xcf7   :  { %2830 = vmax.xlane.f32.xlu0 %v2829_v51 }
 0xcfa   :  { %v2577_v52 = vpop.f32.mrb[30].mxu1 }
 0xcfb   :  { %v2819_v54 = vadd.f32 %v2577_v52, %v5282_v14  ;;  %2833 = vmax.xlane.f32.xlu0 %v2832_v53  ;;  %v4556_v55 = vpop.f32.mrb[31].mxu1  ;;  %v2655_v56 = vpop.f32.mrb[26].mxu0 }
 0xcfc   :  { %v2820_v57 = vadd.f32 %v2655_v56, %v5282_v14  ;;  %v4561_v58 = vpop.f32.mrb[27].mxu0 }
 0xcfd   :  { %v2835_v59 = vsel %vm947_vm6, %v2819_v54, -inf }
 0xcfe   :  { %2836 = vmax.xlane.f32.xlu1 %v2835_v59  ;;  %v2733_v61 = vpop.f32.mrb[32].mxu1  ;;  %v2838_v60 = vsel %vm947_vm6, %v2820_v57, -inf }
 0xcff   :  { %v2821_v62 = vadd.f32 %v2733_v61, %v5282_v14  ;;  %v4566_v63 = vpop.f32.mrb[33].mxu1  ;;  %2839 = vmax.xlane.f32.xlu0 %v2838_v60 }
 0xd01   :  { %v2841_v0 = vsel %vm947_vm6, %v2821_v62, -inf }
 0xd02   :  { %2842 = vmax.xlane.f32.xlu1 %v2841_v0 }
 0xd03   :  { %v2811_v1 = vpop.f32.mrb[28].mxu0 }
 0xd04   :  { %v2822_v2 = vadd.f32 %v2811_v1, %v5282_v14  ;;  %v4571_v3 = vpop.f32.mrb[29].mxu0 }
 0xd06   :  { %v2844_v4 = vsel %vm947_vm6, %v2822_v2, -inf }
 0xd07   :  { %2845 = vmax.xlane.f32.xlu0 %v2844_v4 }
 0xd13   :  { %2985 = vrot.lane.b32.xlu1 %v2177_v23, %s5014_s27 }
 0xd17   :  { %3137 = vrot.lane.b32.xlu1 %v2177_v23, %s5016_s29 }
 0xd1b   :  { %3302 = vrot.lane.b32.xlu1 %v5586_v20, %s5014_s27 }
 0xd1d   :  { %3061 = vrot.lane.b32.xlu0 %v2177_v23, %s5015_s28 }
 0xd7b   :  { %v2825_v5 = vpop.xlane.xlu0 %2824 }
 0xd7c   :  { %v2847_v7 = vsub.f32 %v2815_v39, %v2825_v5 }
 0xd7e   :  { %v2855_v8 = vmul.f32 1.442695, %v2847_v7 }
 0xd7f   :  { %v2828_v11 = vpop.xlane.xlu1 %2827 }
 0xd80   :  { %4963 = vpow2.f32 %v2855_v8  ;;  %v2848_v13 = vsub.f32 %v2816_v44, %v2828_v11 }
 0xd82   :  { %v2857_v19 = vmul.f32 1.442695, %v2848_v13 }
 0xd84   :  { %v2831_v12 = vpop.xlane.xlu0 %2830 }
 0xd85   :  { %v2849_v14 = vsub.f32 %v2817_v48, %v2831_v12 }
 0xd87   :  { %v2859_v15 = vmul.f32 1.442695, %v2849_v14 }
 0xd88   :  { %v2834_v16 = vpop.xlane.xlu0 %2833 }
 0xd89   :  { %4965 = vpow2.f32 %v2859_v15  ;;  %v2850_v17 = vsub.f32 %v2818_v50, %v2834_v16 }
 0xd8a   :  { %v4964_v18 = vpop.eup %4963 }
 0xd8b   :  { %v2861_v30 = vmul.f32 1.442695, %v2850_v17  ;;  %v2837_v34 = vpop.xlane.xlu1 %2836  ;;  %v2871_v21 = vsel %vm947_vm6, %v4964_v18, 0.0  ;;  %v4108_v17 = vld [vmem:[%s5900_s3 + $0x110] sm:$0xff] }
 0xd8c   :  { %v2851_v22 = vsub.f32 %v2819_v54, %v2837_v34  ;;  %2872 = vadd.xlane.f32.xlu1 %v2871_v21  ;;  %v2840_v24 = vpop.xlane.xlu0 %2839  ;;  %v4111_v21 = vld [vmem:[%s5900_s3 + $0x170] sm:$0xff] }
 0xd8d   :  { %4967 = vpow2.f32 %v2861_v30  ;;  %v2852_v26 = vsub.f32 %v2820_v57, %v2840_v24 }
 0xd8e   :  { %v2863_v27 = vmul.f32 1.442695, %v2851_v22  ;;  %4969 = vpow2.f32 %v2857_v19 }
 0xd8f   :  { %v2865_v29 = vmul.f32 1.442695, %v2852_v26  ;;  %v2843_v31 = vpop.xlane.xlu1 %2842  ;;  %v4112_v26 = vld [vmem:[%s5900_s3 + $0x190] sm:$0xff] }
 0xd90   :  { %4971 = vpow2.f32 %v2863_v27  ;;  %v2853_v32 = vsub.f32 %v2821_v62, %v2843_v31  ;;  %v4113_v27 = vld [vmem:[%s5900_s3 + $0x1b0] sm:$0xff] }
 0xd91   :  { %4973 = vpow2.f32 %v2865_v29  ;;  %v4832_v31 = vpack.c.bf16 %v4113_v27, %v4112_v26 }
 0xd92   :  { %v2867_v33 = vmul.f32 1.442695, %v2853_v32  ;;  %v4114_v32 = vld [vmem:[%s5900_s3 + $0x1d0] sm:$0xff] }
 0xd93   :  { %v4966_v35 = vpop.eup %4965  ;;  %v2986_v23 = vpop.permute.xlu1 %2985 }
 0xd94   :  { %4975 = vpow2.f32 %v2867_v33  ;;  %v2846_v36 = vpop.xlane.xlu0 %2845  ;;  %4578 = vmatpush3.msra.mxu0 %v2986_v23  ;;  %v2877_v37 = vsel %vm947_vm6, %v4966_v35, 0.0  ;;  %v4115_v33 = vld [vmem:[%s5900_s3 + $0x1f0] sm:$0xff] }
 0xd95   :  { %v2854_v38 = vsub.f32 %v2822_v2, %v2846_v36  ;;  %2878 = vadd.xlane.f32.xlu1 %v2877_v37  ;;  %4587 = vmatprep.subr.mxu0 %v5008_v9 }
 0xd97   :  { %v5665_v40 = vpop.eup %4967  ;;  %v2869_v39 = vmul.f32 1.442695, %v2854_v38  ;;  %v3138_v50 = vpop.permute.xlu1 %3137 }
 0xd98   :  { %v2880_v41 = vsel %vm947_vm6, %v5665_v40, 0.0  ;;  %v4970_v42 = vpop.eup %4969  ;;  %v3062_v53 = vpop.permute.xlu0 %3061 }
 0xd99   :  { %4977 = vpow2.f32 %v2869_v39  ;;  %2881 = vadd.xlane.f32.xlu0 %v2880_v41  ;;  %v2874_v25 = vsel %vm947_vm6, %v4970_v42, 0.0 }
 0xd9a   :  { %v4972_v43 = vpop.eup %4971 }
 0xd9b   :  { %v2883_v44 = vsel %vm947_vm6, %v4972_v43, 0.0  ;;  %v5671_v28 = vpop.eup %4973  ;;  %v3303_v51 = vpop.permute.xlu1 %3302 }
 0xd9c   :  { %2884 = vadd.xlane.f32.xlu1 %v2883_v44  ;;  %v2886_v47 = vsel %vm947_vm6, %v5671_v28, 0.0 }
 0xd9d   :  { %2875 = vadd.xlane.f32.xlu0 %v2874_v25 }
 0xd9e   :  { %v4976_v45 = vpop.eup %4975 }
 0xd9f   :  { %v2889_v46 = vsel %vm947_vm6, %v4976_v45, 0.0 }
 0xda0   :  { %2890 = vadd.xlane.f32.xlu1 %v2889_v46 }
 0xda1   :  { %2887 = vadd.xlane.f32.xlu0 %v2886_v47 }
 0xda3   :  { %v5676_v48 = vpop.eup %4977 }
 0xda4   :  { %v2892_v49 = vsel %vm947_vm6, %v5676_v48, 0.0 }
 0xda5   :  { %2893 = vadd.xlane.f32.xlu0 %v2892_v49 }
 0xdb1   :  { %3454 = vrot.lane.b32.xlu1 %v5586_v20, %s5016_s29 }
 0xdbb   :  { %3378 = vrot.lane.b32.xlu0 %v5586_v20, %s5015_s28 }
 0xe19   :  { %v2873_v52 = vpop.xlane.xlu1 %2872 }
 0xe1a   :  { %4979 = vrcp.f32 %v2873_v52 }
 0xe22   :  { %v2879_v54 = vpop.xlane.xlu1 %2878 }
 0xe23   :  { %4981 = vrcp.f32 %v2879_v54 }
 0xe24   :  { %v4980_v55 = vpop.eup %4979 }
 0xe25   :  { %v2903_v56 = vmul.f32 %v4980_v55, %v4964_v18  ;;  %v4109_v18 = vld [vmem:[%s5900_s3 + $0x130] sm:$0xff] }
 0xe26   :  { %v2882_v57 = vpop.xlane.xlu0 %2881  ;;  %v4824_v19 = vpack.c.bf16 %v4109_v18, %v4108_v17  ;;  %v4160_v18 = vld [vmem:[%s5903_s4 + $0x80] sm:$0xff] }
 0xe27   :  { %4575 = vmatmul.mubr.msk.f32.vlgmr.msra.gmra.mrb[34].mxu1 %vm947_vm6, %v2903_v56 }
 0xe28   :  { %4583 = vmatpush3.msra.mxu1 %v3062_v53  ;;  %4584 = vmatprep.mubr.msk.f32.mxu1 %vm5009_vm4, %v5008_v9 }
 0xe29   :  { %v2885_v58 = vpop.xlane.xlu1 %2884  ;;  %4592 = vmatprep.subr.mxu1 %v5008_v9 }
 0xe2a   :  { %4983 = vrcp.f32 %v2885_v58  ;;  %v2876_v59 = vpop.xlane.xlu0 %2875 }
 0xe2b   :  { %4985 = vrcp.f32 %v2876_v59 }
 0xe2c   :  { %4987 = vrcp.f32 %v2882_v57  ;;  %v4141_v57 = vld [vmem:[%s5901_s5 + $0xb] ss:$0 sm:$0xff] }
 0xe2d   :  { %v4982_v61 = vpop.eup %4981  ;;  %v2891_v60 = vpop.xlane.xlu1 %2890 }
 0xe2e   :  { %v2905_v62 = vmul.f32 %v4982_v61, %v4966_v35  ;;  %4989 = vrcp.f32 %v2891_v60  ;;  %v2888_v63 = vpop.xlane.xlu0 %2887  ;;  %v4836_v35 = vpack.c.bf16 %v4115_v33, %v4114_v32 }
 0xe2f   :  { %4991 = vrcp.f32 %v2888_v63 }
 0xe30   :  { %4585 = vmatmul.mubr.msk.f32.vlgmr.msra.gmra.mrb[36].mxu1 %vm947_vm6, %v2905_v62 }
 0xe31   :  { %4593 = vmatpush3.msra.mxu1 %v5586_v20  ;;  %4594 = vmatprep.mubr.msk.f32.mxu1 %vm5009_vm4, %v5008_v9  ;;  %v3455_v15 = vpop.permute.xlu1 %3454 }
 0xe32   :  { %v2894_v0 = vpop.xlane.xlu0 %2893  ;;  %4602 = vmatprep.subr.mxu1 %v5008_v9 }
 0xe33   :  { %4993 = vrcp.f32 %v2894_v0 }
 0xe34   :  { %v4984_v1 = vpop.eup %4983 }
 0xe35   :  { %v4986_v2 = vpop.eup %4985  ;;  %v2907_v3 = vmul.f32 %v4984_v1, %v4972_v43 }
 0xe36   :  { %v2904_v4 = vmul.f32 %v4986_v2, %v4970_v42  ;;  %v3379_v5 = vpop.permute.xlu0 %3378  ;;  %v4988_v7 = vpop.eup %4987 }
 0xe37   :  { %4595 = vmatmul.mubr.msk.f32.vlgmr.msra.gmra.mrb[38].mxu1 %vm947_vm6, %v2907_v3  ;;  %v2906_v11 = vmul.f32 %v4988_v7, %v5665_v40 }
 0xe38   :  { %v4990_v8 = vpop.eup %4989  ;;  %4603 = vmatpush3.msra.mxu1 %v3379_v5  ;;  %4580 = vmatmul.mubr.msk.f32.vlgmr.msra.gmra.mrb[30].mxu0 %vm947_vm6, %v2904_v4 }
 0xe39   :  { %v2909_v20 = vmul.f32 %v4990_v8, %v4976_v45  ;;  %4588 = vmatpush3.msra.mxu0 %v3138_v50  ;;  %4604 = vmatprep.mubr.msk.f32.mxu1 %vm5009_vm4, %v5008_v9  ;;  %v4992_v12 = vpop.eup %4991  ;;  %v4150_v8 = vld [vmem:[%s5900_s3 + $0x158] sm:$0xff] }
 0xe3a   :  { %4589 = vmatprep.mubr.msk.f32.mxu0 %vm5009_vm4, %v5008_v9  ;;  %4597 = vmatprep.subr.mxu0 %v5008_v9  ;;  %v2908_v14 = vmul.f32 %v4992_v12, %v5671_v28  ;;  %v4152_v12 = vld [vmem:[%s5900_s3 + $0x198] sm:$0xff] }
 0xe3b   :  { %4605 = vmatmul.mubr.msk.f32.vlgmr.msra.gmra.mrb[40].mxu1 %vm947_vm6, %v2909_v20  ;;  %4825 = vmatprep.subr.bf16.mxu1 %v4824_v19  ;;  %v4151_v20 = vld [vmem:[%s5900_s3 + $0x178] sm:$0xff] }
 0xe3c   :  { %4590 = vmatmul.mubr.msk.f32.vlgmr.msra.gmra.mrb[32].mxu0 %vm947_vm6, %v2906_v11  ;;  %4827 = vmatpush3.bf16.msra.mxu1 %v4824_v19  ;;  %v4844_v11 = vpack.c.bf16 %v4151_v20, %v4150_v8  ;;  %v4161_v19 = vld [vmem:[%s5903_s4 + $0x88] sm:$0xff] }
 0xe3d   :  { %4598 = vmatpush3.msra.mxu0 %v3303_v51  ;;  %4599 = vmatprep.mubr.msk.f32.mxu0 %vm5009_vm4, %v5008_v9  ;;  %v4994_v13 = vpop.eup %4993 }
 0xe3e   :  { %4607 = vmatprep.subr.mxu0 %v5008_v9  ;;  %v2910_v16 = vmul.f32 %v4994_v13, %v5676_v48 }
 0xe40   :  { %4600 = vmatmul.mubr.msk.f32.vlgmr.msra.gmra.mrb[34].mxu0 %vm947_vm6, %v2908_v14  ;;  %v4153_v14 = vld [vmem:[%s5900_s3 + $0x1b8] sm:$0xff] }
 0xe41   :  { %4608 = vmatpush3.msra.mxu0 %v3455_v15  ;;  %4609 = vmatprep.mubr.msk.f32.mxu0 %vm5009_vm4, %v5008_v9  ;;  %v4110_v9 = vld [vmem:[%s5900_s3 + $0x150] sm:$0xff]  ;;  %v4848_v13 = vpack.c.bf16 %v4153_v14, %v4152_v12  ;;  %v4154_v15 = vld [vmem:[%s5900_s3 + $0x1d8] sm:$0xff] }
 0xe42   :  { %v4828_v22 = vpack.c.bf16 %v4111_v21, %v4110_v9 }
 0xe44   :  { %4610 = vmatmul.mubr.msk.f32.vlgmr.msra.gmra.mrb[36].mxu0 %vm947_vm6, %v2910_v16  ;;  %4829 = vmatprep.subr.bf16.mxu1 %v4828_v22  ;;  %v4155_v16 = vld [vmem:[%s5900_s3 + $0x1f8] sm:$0xff] }
 0xe45   :  { %4831 = vmatpush3.bf16.msra.mxu1 %v4828_v22  ;;  %v4852_v17 = vpack.c.bf16 %v4155_v16, %v4154_v15 }
 0xe46   :  { %4833 = vmatprep.subr.bf16.mxu1 %v4832_v31 }
 0xe49   :  { %4835 = vmatpush3.bf16.msra.mxu1 %v4832_v31 }
 0xe4a   :  { %4837 = vmatprep.subr.bf16.mxu1 %v4836_v35 }
 0xe4d   :  { %4839 = vmatpush3.bf16.msra.mxu1 %v4836_v35 }
 0xefa   :  { %v2980_v30 = vpop.f32.mrb[34].mxu1 }
 0xefb   :  { %v4576_v34 = vpop.f32.mrb[35].mxu1 }
 0xf03   :  { %v3133_v24 = vpop.f32.mrb[36].mxu1 }
 0xf04   :  { %3218 = vrot.lane.b32.xlu1 %v3133_v24, %s5013_s26  ;;  %v4586_v29 = vpop.f32.mrb[37].mxu1 }
 0xf0a   :  { %v3297_v23 = vpop.f32.mrb[38].mxu1 }
 0xf0b   :  { %v3057_v36 = vpop.f32.mrb[30].mxu0  ;;  %v4596_v37 = vpop.f32.mrb[39].mxu1 }
 0xf0c   :  { %3214 = vrot.lane.b32.xlu0 %v3057_v36, %s5010_s23  ;;  %v4581_v38 = vpop.f32.mrb[31].mxu0 }
 0xf0e   :  { %v3450_v40 = vpop.f32.mrb[40].mxu1 }
 0xf0f   :  { %v3209_v39 = vpop.f32.mrb[32].mxu0  ;;  %v4606_v41 = vpop.f32.mrb[41].mxu1 }
 0xf10   :  { %v4591_v42 = vpop.f32.mrb[33].mxu0  ;;  %3222 = vrot.lane.b32.xlu1 %v3209_v39, %s5012_s25  ;;  %v4147_v41 = vld [vmem:[%s5901_s5 + $0xd] ss:$0 sm:$0xff] }
 0xf13   :  { %v3374_v43 = vpop.f32.mrb[34].mxu0 }
 0xf14   :  { %3531 = vrot.lane.b32.xlu0 %v3374_v43, %s5010_s23  ;;  %v4601_v44 = vpop.f32.mrb[35].mxu0 }
 0xf17   :  { %v3526_v25 = vpop.f32.mrb[36].mxu0 }
 0xf18   :  { %3535 = vrot.lane.b32.xlu0 %v3450_v40, %s5013_s26  ;;  %3539 = vrot.lane.b32.xlu1 %v3526_v25, %s5012_s25  ;;  %v4611_v28 = vpop.f32.mrb[37].mxu0  ;;  %v4146_v40 = vld [vmem:[%s5901_s5 + $0xc] ss:$0 sm:$0xff] }
 0xf76   :  { %v3219_v45 = vpop.permute.xlu1 %3218 }
 0xf7e   :  { %v3215_v46 = vpop.permute.xlu0 %3214 }
 0xf7f   :  { %v3225_v47 = vsel %vm319_vm5, %v2980_v30, %v3215_v46  ;;  %v4856_v30 = vpack.c.bf16 %v4161_v19, %v4160_v18 }
 0xf80   :  { %v3226_v48 = vsel %vm1351_vm7, %v3225_v47, %v3219_v45  ;;  %v4162_v47 = vld [vmem:[%s5903_s4 + $0x90] sm:$0xff] }
 0xf81   :  { %4857 = vmatprep.subr.bf16.mxu1 %v4856_v30 }
 0xf82   :  { %v3223_v49 = vpop.permute.xlu1 %3222 }
 0xf83   :  { %v3227_v50 = vsel %vm1353_vm8, %v3226_v48, %v3223_v49  ;;  %v4163_v48 = vld [vmem:[%s5903_s4 + $0x98] sm:$0xff] }
 0xf84   :  { %4628 = vmatprep.mubr.msk.f32.mxu1 %vm153_vm3, %v3227_v50  ;;  %v4860_v49 = vpack.c.bf16 %v4163_v48, %v4162_v47  ;;  %v4164_v50 = vld [vmem:[%s5903_s4 + $0xa0] sm:$0xff]  ;;  %v3951_v47 = vld [vmem:[%s5904_s6 + $0x28] sm:$0xff] }
 0xf86   :  { %v3532_v51 = vpop.permute.xlu0 %3531 }
 0xf87   :  { %v3542_v52 = vsel %vm319_vm5, %v3297_v23, %v3532_v51  ;;  %v4165_v51 = vld [vmem:[%s5903_s4 + $0xa8] sm:$0xff] }
 0xf8a   :  { %v3536_v53 = vpop.permute.xlu0 %3535  ;;  %v3540_v54 = vpop.permute.xlu1 %3539 }
 0xf8b   :  { %v3543_v55 = vsel %vm1351_vm7, %v3542_v52, %v3536_v53  ;;  %v4864_v52 = vpack.c.bf16 %v4165_v51, %v4164_v50  ;;  %v4166_v53 = vld [vmem:[%s5903_s4 + $0xb0] sm:$0xff]  ;;  %v3953_v50 = vld [vmem:[%s5904_s6 + $0x38] sm:$0xff] }
 0xf8c   :  { %v3544_v56 = vsel %vm1353_vm8, %v3543_v55, %v3540_v54  ;;  %v4167_v54 = vld [vmem:[%s5903_s4 + $0xb8] sm:$0xff] }
 0xf8d   :  { %4629 = vmatmul.mubr.msk.f32.vlgmr.msra.gmra.mrb[42].mxu1 %vm153_vm3, %v3544_v56  ;;  %v4868_v55 = vpack.c.bf16 %v4167_v54, %v4166_v53  ;;  %v4168_v56 = vld [vmem:[%s5903_s4 + $0xc0] sm:$0xff] }
 0xf8e   :  { %4859 = vmatpush3.bf16.msra.mxu1 %v4856_v30 }
 0xf8f   :  { %4861 = vmatprep.subr.bf16.mxu1 %v4860_v49 }
 0xf92   :  { %4863 = vmatpush3.bf16.msra.mxu1 %v4860_v49  ;;  %v3952_v49 = vld [vmem:[%s5904_s6 + $0x30] sm:$0xff] }
 0xf93   :  { %4865 = vmatprep.subr.bf16.mxu1 %v4864_v52  ;;  %v4900_v51 = vpack.c.bf16 %v3953_v50, %v3952_v49 }
 0xf96   :  { %4867 = vmatpush3.bf16.msra.mxu1 %v4864_v52 }
 0xf97   :  { %4869 = vmatprep.subr.bf16.mxu1 %v4868_v55 }
 0xf9a   :  { %4871 = vmatpush3.bf16.msra.mxu1 %v4868_v55 }
0x1060   :  { %v4630_v58 = vpop.f32.mrb[42].mxu1 }
0x1061   :  { %v3630_v59 = vadd.f32 %v4630_v58, %v4141_v57  ;;  %v3624_v61 = vpop.f32.mrb[43].mxu1 }
0x1062   :  { %v3625_v60 = vadd.f32 %v4141_v57, %v3624_v61  ;;  %v4169_v57 = vld [vmem:[%s5903_s4 + $0xc8] sm:$0xff]  ;;  %v4171_v61 = vld [vmem:[%s5903_s4 + $0xd8] sm:$0xff] }
0x1063   :  { %v3634_v62 = vadd.f32 %v3630_v59, %v5573_v10  ;;  %v4148_v10 = vld [vmem:[%s5900_s3 + $0x118] sm:$0xff]  ;;  %v4872_v58 = vpack.c.bf16 %v4169_v57, %v4168_v56  ;;  %v4170_v59 = vld [vmem:[%s5903_s4 + $0xd0] sm:$0xff] }
0x1064   :  { %v3633_v63 = vadd.f32 %v3625_v60, %v5568_v6  ;;  %v4149_v6 = vld [vmem:[%s5900_s3 + $0x138] sm:$0xff]  ;;  %v4876_v60 = vpack.c.bf16 %v4171_v61, %v4170_v59 }
0x1065   :  { %v3640_v0 = vsel %vm153_vm3, %v3634_v62, 0.0  ;;  %v3646_v4 = vmul.f32 %v3634_v62, %v3634_v62  ;;  %v4840_v7 = vpack.c.bf16 %v4149_v6, %v4148_v10  ;;  %4873 = vmatprep.subr.bf16.mxu1 %v4872_v58 }
0x1066   :  { %3641 = vadd.xlane.f32.xlu1 %v3640_v0  ;;  %v3637_v1 = vsel %vm153_vm3, %v3633_v63, 0.0  ;;  %v3645_v2 = vmul.f32 %v3633_v63, %v3633_v63  ;;  %4875 = vmatpush3.bf16.msra.mxu1 %v4872_v58 }
0x1067   :  { %3638 = vadd.xlane.f32.xlu0 %v3637_v1  ;;  %v3650_v5 = vsel %vm153_vm3, %v3646_v4, 0.0  ;;  %4841 = vmatprep.subr.bf16.mxu0 %v4840_v7  ;;  %v4174_v1 = vld [vmem:[%s5903_s4 + $0xf0] sm:$0xff]  ;;  %v4157_v4 = vld [vmem:[%s5901_s5 + $0xe] ss:$0 sm:$0xff] }
0x1068   :  { %v3647_v3 = vsel %vm153_vm3, %v3645_v2, 0.0  ;;  %4843 = vmatpush3.bf16.msra.mxu0 %v4840_v7  ;;  %4877 = vmatprep.subr.bf16.mxu1 %v4876_v60  ;;  %v4175_v2 = vld [vmem:[%s5903_s4 + $0xf8] sm:$0xff] }
0x1069   :  { %4845 = vmatprep.subr.bf16.mxu0 %v4844_v11 }
0x106a   :  { %4879 = vmatpush3.bf16.msra.mxu1 %v4876_v60 }
0x106b   :  { %3648 = vadd.xlane.f32.xlu0 %v3647_v3  ;;  %v4884_v3 = vpack.c.bf16 %v4175_v2, %v4174_v1 }
0x106c   :  { %4847 = vmatpush3.bf16.msra.mxu0 %v4844_v11 }
0x106d   :  { %4849 = vmatprep.subr.bf16.mxu0 %v4848_v13 }
0x106f   :  { %3651 = vadd.xlane.f32.xlu0 %v3650_v5 }
0x1070   :  { %4851 = vmatpush3.bf16.msra.mxu0 %v4848_v13 }
0x1071   :  { %4853 = vmatprep.subr.bf16.mxu0 %v4852_v17 }
0x1074   :  { %4855 = vmatpush3.bf16.msra.mxu0 %v4852_v17 }
0x10f3   :  { %v3642_v21 = vpop.xlane.xlu1 %3641 }
0x10f4   :  { %v3639_v34 = vpop.xlane.xlu0 %3638  ;;  %v3644_v24 = vmul.f32 0.015625, %v3642_v21 }
0x10f5   :  { %v3643_v9 = vmul.f32 0.015625, %v3639_v34 }
0x10f6   :  { %v3656_v32 = vmul.f32 %v3644_v24, %v3644_v24  ;;  %v3660_v42 = vsub.f32 %v3634_v62, %v3644_v24  ;;  %v4172_v62 = vld [vmem:[%s5903_s4 + $0xe0] sm:$0xff] }
0x10f7   :  { %v3655_v26 = vmul.f32 %v3643_v9, %v3643_v9  ;;  %v3659_v37 = vsub.f32 %v3633_v63, %v3643_v9  ;;  %v4173_v63 = vld [vmem:[%s5903_s4 + $0xe8] sm:$0xff] }
0x10f8   :  { %v3649_v22 = vpop.xlane.xlu0 %3648  ;;  %v4880_v0 = vpack.c.bf16 %v4173_v63, %v4172_v62 }
0x10f9   :  { %v3653_v27 = vmul.f32 0.015625, %v3649_v22 }
0x10fa   :  { %4881 = vmatprep.subr.bf16.mxu1 %v4880_v0 }
0x10fb   :  { %v3657_v29 = vsub.f32 %v3653_v27, %v3655_v26  ;;  %4883 = vmatpush3.bf16.msra.mxu1 %v4880_v0  ;;  %v4177_v27 = vld [vmem:[%s5901_s5 + $0xf] ss:$0 sm:$0xff] }
0x10fc   :  { %v3652_v31 = vpop.xlane.xlu0 %3651  ;;  %4885 = vmatprep.subr.bf16.mxu1 %v4884_v3 }
0x10fd   :  { %v3661_v33 = vadd.f32 1e-12, %v3657_v29  ;;  %v3654_v35 = vmul.f32 0.015625, %v3652_v31 }
0x10ff   :  { %4995 = vrsqrt.f32 %v3661_v33  ;;  %v3658_v23 = vsub.f32 %v3654_v35, %v3656_v32  ;;  %4887 = vmatpush3.bf16.msra.mxu1 %v4884_v3 }
0x1101   :  { %v3662_v36 = vadd.f32 1e-12, %v3658_v23 }
0x1103   :  { %4997 = vrsqrt.f32 %v3662_v36 }
0x1109   :  { %v4996_v38 = vpop.eup %4995 }
0x110a   :  { %v3665_v39 = vmul.f32 %v4996_v38, %v3659_v37 }
0x110c   :  { %v3673_v43 = vmul.f32 %v4146_v40, %v3665_v39 }
0x110d   :  { %v4998_v44 = vpop.eup %4997 }
0x110e   :  { %v3666_v25 = vmul.f32 %v4998_v44, %v3660_v42  ;;  %v5795_v28 = vadd.f32 %v4147_v41, %v3673_v43  ;;  %v3946_v42 = vld [vmem:[%s5904_s6] sm:$0xff]  ;;  %v3947_v43 = vld [vmem:[%s5904_s6 + $0x8] sm:$0xff]  ;;  %v3948_v44 = vld [vmem:[%s5904_s6 + $0x10] sm:$0xff] }
0x1110   :  { %v3674_v45 = vmul.f32 %v4146_v40, %v3666_v25  ;;  %4647 = vmatprep.mubr.msk.f32.mxu0 %vm153_vm3, %v5795_v28  ;;  %v4888_v25 = vpack.c.bf16 %v3947_v43, %v3946_v42 }
0x1112   :  { %v5799_v46 = vadd.f32 %v4147_v41, %v3674_v45  ;;  %4889 = vmatprep.subr.bf16.mxu0 %v4888_v25 }
0x1114   :  { %4648 = vmatmul.mubr.msk.f32.vlgmr.msra.gmra.mrb[38].mxu0 %vm153_vm3, %v5799_v46 }
0x1115   :  { %4891 = vmatpush3.bf16.msra.mxu0 %v4888_v25 }
0x11e7   :  { %v4649_v5 = vpop.f32.mrb[38].mxu0 }
0x11e8   :  { %v3776_v10 = vadd.f32 %v4649_v5, %v4157_v4  ;;  %v3770_v6 = vpop.f32.mrb[39].mxu0  ;;  %v4180_v5 = vld [vmem:[%s5901_s5 + $0x10] ss:$0 sm:$0xff] }
0x11e9   :  { %v3771_v7 = vadd.f32 %v4157_v4, %v3770_v6 }
0x11ea   :  { %v3782_v8 = vmul.f32 0.044715, %v3776_v10  ;;  %v3780_v22 = vmul.f32 0.5, %v3776_v10 }
0x11eb   :  { %v3781_v20 = vmul.f32 0.044715, %v3771_v7  ;;  %v3779_v9 = vmul.f32 0.5, %v3771_v7 }
0x11ec   :  { %v3784_v11 = vmul.f32 %v3782_v8, %v3776_v10  ;;  %v4181_v8 = vld [vmem:[%s5901_s5 + $0x11] ss:$0 sm:$0xff] }
0x11ed   :  { %v3783_v12 = vmul.f32 %v3781_v20, %v3771_v7 }
0x11ee   :  { %v3786_v14 = vmul.f32 %v3784_v11, %v3776_v10 }
0x11ef   :  { %v3785_v13 = vmul.f32 %v3783_v12, %v3771_v7 }
0x11f0   :  { %v3788_v15 = vadd.f32 %v3786_v14, %v3776_v10 }
0x11f1   :  { %v3787_v16 = vadd.f32 %v3785_v13, %v3771_v7  ;;  %v4182_v13 = vld [vmem:[%s5904_s6 + $0x40] ss:$0 sm:$0xff] }
0x11f2   :  { %v3790_v17 = vmul.f32 0.7978846, %v3788_v15 }
0x11f3   :  { %v3789_v18 = vmul.f32 0.7978846, %v3787_v16 }
0x11f4   :  { %4999 = vtanh.f32 %v3790_v17 }
0x11f5   :  { %5001 = vtanh.f32 %v3789_v18 }
0x11fe   :  { %v5000_v19 = vpop.eup %4999 }
0x11ff   :  { %v5002_v30 = vpop.eup %5001  ;;  %v3794_v34 = vadd.f32 1.0, %v5000_v19 }
0x1200   :  { %v3793_v21 = vadd.f32 1.0, %v5002_v30 }
0x1201   :  { %v3796_v26 = vmul.f32 %v3794_v34, %v3780_v22 }
0x1202   :  { %v3795_v24 = vmul.f32 %v3793_v21, %v3779_v9 }
0x1204   :  { %4682 = vmatprep.mubr.f32.mxu1 %v3795_v24 }
0x1205   :  { %4683 = vmatmul.mubr.f32.vlgmr.msra.gmra.mrb[44].mxu1 %v3796_v26 }
0x12d8   :  { %v4684_v29 = vpop.f32.mrb[44].mxu1 }
0x12d9   :  { %v3893_v31 = vadd.f32 %v4684_v29, %v4177_v27  ;;  %v3887_v32 = vpop.f32.mrb[45].mxu1 }
0x12da   :  { %v3888_v33 = vadd.f32 %v4177_v27, %v3887_v32 }
0x12db   :  { %v3897_v35 = vadd.f32 %v3893_v31, %v5799_v46  ;;  %v3950_v46 = vld [vmem:[%s5904_s6 + $0x20] sm:$0xff] }
0x12dc   :  { %v3896_v23 = vadd.f32 %v3888_v33, %v5795_v28  ;;  %v3949_v28 = vld [vmem:[%s5904_s6 + $0x18] sm:$0xff]  ;;  %v4896_v48 = vpack.c.bf16 %v3951_v47, %v3950_v46 }
0x12dd   :  { %v3903_v36 = vsel %vm153_vm3, %v3897_v35, 0.0  ;;  %v3909_v37 = vmul.f32 %v3897_v35, %v3897_v35  ;;  %v4892_v45 = vpack.c.bf16 %v3949_v28, %v3948_v44 }
0x12de   :  { %3904 = vadd.xlane.f32.xlu0 %v3903_v36  ;;  %v3900_v38 = vsel %vm153_vm3, %v3896_v23, 0.0  ;;  %v3908_v40 = vmul.f32 %v3896_v23, %v3896_v23 }
0x12df   :  { %3901 = vadd.xlane.f32.xlu1 %v3900_v38  ;;  %v3913_v39 = vsel %vm153_vm3, %v3909_v37, 0.0  ;;  %4893 = vmatprep.subr.bf16.mxu0 %v4892_v45 }
0x12e0   :  { %v3910_v41 = vsel %vm153_vm3, %v3908_v40, 0.0  ;;  %4895 = vmatpush3.bf16.msra.mxu0 %v4892_v45 }
0x12e1   :  { %4897 = vmatprep.subr.bf16.mxu0 %v4896_v48 }
0x12e2   :  { %3914 = vadd.xlane.f32.xlu0 %v3913_v39 }
0x12e3   :  { %3911 = vadd.xlane.f32.xlu1 %v3910_v41 }
0x12e4   :  { %4899 = vmatpush3.bf16.msra.mxu0 %v4896_v48 }
0x12e5   :  { %4901 = vmatprep.subr.bf16.mxu0 %v4900_v51 }
0x12e8   :  { %4903 = vmatpush3.bf16.msra.mxu0 %v4900_v51 }
0x136b   :  { %v3905_v52 = vpop.xlane.xlu0 %3904 }
0x136c   :  { %v3907_v53 = vmul.f32 0.015625, %v3905_v52  ;;  %v3902_v54 = vpop.xlane.xlu1 %3901 }
0x136d   :  { %v3906_v55 = vmul.f32 0.015625, %v3902_v54 }
0x136e   :  { %v3919_v57 = vmul.f32 %v3907_v53, %v3907_v53  ;;  %v3923_v2 = vsub.f32 %v3897_v35, %v3907_v53 }
0x136f   :  { %v3915_v56 = vpop.xlane.xlu0 %3914  ;;  %v3918_v61 = vmul.f32 %v3906_v55, %v3906_v55  ;;  %v3922_v4 = vsub.f32 %v3896_v23, %v3906_v55 }
0x1370   :  { %v3917_v58 = vmul.f32 0.015625, %v3915_v56  ;;  %v3912_v59 = vpop.xlane.xlu1 %3911 }
0x1371   :  { %v3916_v60 = vmul.f32 0.015625, %v3912_v59 }
0x1372   :  { %v3921_v62 = vsub.f32 %v3917_v58, %v3919_v57 }
0x1373   :  { %v3920_v63 = vsub.f32 %v3916_v60, %v3918_v61 }
0x1374   :  { %v3925_v0 = vadd.f32 1e-12, %v3921_v62 }
0x1375   :  { %v3924_v1 = vadd.f32 1e-12, %v3920_v63 }
0x1376   :  { %5003 = vrsqrt.f32 %v3925_v0 }
0x1377   :  { %5005 = vrsqrt.f32 %v3924_v1 }
0x1380   :  { %v5004_v3 = vpop.eup %5003 }
0x1381   :  { %v5006_v10 = vpop.eup %5005  ;;  %v3929_v6 = vmul.f32 %v5004_v3, %v3923_v2 }
0x1382   :  { %v3928_v7 = vmul.f32 %v5006_v10, %v3922_v4 }
0x1383   :  { %v3937_v20 = vmul.f32 %v4180_v5, %v3929_v6 }
0x1384   :  { %v3936_v11 = vmul.f32 %v4180_v5, %v3928_v7 }
0x1385   :  { %v3945_v14 = vadd.f32 %v4181_v8, %v3937_v20 }
0x1386   :  { %v3944_v12 = vadd.f32 %v4181_v8, %v3936_v11 }
0x1388   :  { %4701 = vmatprep.mubr.msk.f32.mxu0 %vm153_vm3, %v3944_v12 }
0x1389   :  { %4702 = vmatmul.mubr.msk.f32.vlgmr.msra.gmra.mrb[40].mxu0 %vm153_vm3, %v3945_v14 }
0x145c   :  { %v4703_v15 = vpop.f32.mrb[40].mxu0 }
0x145d   :  { %v4037_v16 = vadd.f32 %v4703_v15, %v4182_v13  ;;  %v4031_v17 = vpop.f32.mrb[41].mxu0 }
0x145e   :  { %v4032_v18 = vadd.f32 %v4182_v13, %v4031_v17 }
0x145f   :  { %4041 = vst [vmem:[%s5905_s7 + $0x8] sm:$0xff] %v4037_v16 }
0x1460   :  { %4040 = vst [vmem:[%s5905_s7] sm:$0xff] %v4032_v18 }

</bundles_post_ra>
